<compile_context>
chip_gen: v7x
topology: tpu7x:2x2x1
jax: 0.10.0
libtpu: 0.0.40
codegen_flags: <defaults>
</compile_context>

<pallas_src>
import functools
import math

import jax
import jax.numpy as jnp
from jax.experimental import pallas as pl
from jax.experimental.pallas import tpu as pltpu

BN_EPS = 1e-5


def _batch_norm(h, gamma, beta):
    """BatchNorm1d (training mode): two-pass batch stats, biased var, f32."""
    r_inv = 1.0 / h.shape[0]
    mean = jnp.sum(h, axis=0, keepdims=True) * r_inv
    centered = h - mean
    var = jnp.sum(centered * centered, axis=0, keepdims=True) * r_inv
    return centered * jax.lax.rsqrt(var + BN_EPS) * gamma + beta


# ---------------------------------------------------------------------------
# Fused encoder kernel: grid axis = layer index ("arbitrary" / sequential).
# ---------------------------------------------------------------------------
def encoder_kernel(x_ref, iw_ref, ib_ref,
                   wq_ref, wk_ref, wv_ref, wo_ref,
                   g1_ref, bt1_ref,
                   w1_ref, b1_ref, w2_ref, b2_ref,
                   g2_ref, bt2_ref,
                   h_out_ref, mean_ref,
                   h_vmem, heads_vmem,
                   *, n_heads, key_dim, n_layers):
    layer = pl.program_id(0)
    B, N, _ = x_ref.shape
    R = B * N
    D = h_vmem.shape[-1]
    H, dk = n_heads, key_dim
    bf16 = jnp.bfloat16
    f32 = jnp.float32

    # ---- first grid step: initial node embedding  h0 = x @ W_init + b_init ----
    @pl.when(layer == 0)
    def _():
        xf = x_ref[...].reshape(R, -1).astype(bf16)
        h_vmem[...] = (jnp.dot(xf, iw_ref[...], preferred_element_type=f32)
                       + ib_ref[...])

    hf = h_vmem[...]                       # (R, D) f32, resident in VMEM
    hb = hf.astype(bf16)

    # ---- multi-head self-attention -------------------------------------------
    # Wide fused projections: (R, D) @ (D, H*dk).  1/sqrt(dk) already folded
    # into W_query.  Cast to bf16 before any per-head reshuffle.
    q = jnp.dot(hb, wq_ref[...], preferred_element_type=f32).astype(bf16)
    k = jnp.dot(hb, wk_ref[...], preferred_element_type=f32).astype(bf16)
    v = jnp.dot(hb, wv_ref[...], preferred_element_type=f32).astype(bf16)

    for hd in range(H):                    # per-head attention math only
        sl = slice(hd * dk, (hd + 1) * dk)
        qh = q[:, sl].reshape(B, N, dk)
        kh = k[:, sl].reshape(B, N, dk)
        vh = v[:, sl].reshape(B, N, dk)

        scores = jnp.einsum('bnd,bmd->bnm', qh, kh, preferred_element_type=f32)
        scores = scores - jnp.max(scores, axis=-1, keepdims=True)
        e = jnp.exp(scores)
        attn = e * pl.reciprocal(jnp.sum(e, axis=-1, keepdims=True), approx=True)
        oh = jnp.einsum('bnm,bmd->bnd', attn.astype(bf16), vh,
                        preferred_element_type=f32)
        # bf16 head output written straight into the (R, H*dk) scratch slab.
        heads_vmem[:, sl] = oh.astype(bf16).reshape(R, dk)

    # Single hoisted output projection: (R, H*dk) @ (H*dk, D).
    mha = jnp.dot(heads_vmem[...], wo_ref[...], preferred_element_type=f32)

    # ---- skip + BN, feed-forward, skip + BN -----------------------------------
    h1 = _batch_norm(hf + mha, g1_ref[...], bt1_ref[...])
    ff = jnp.maximum(
        jnp.dot(h1.astype(bf16), w1_ref[...], preferred_element_type=f32)
        + b1_ref[...], 0.0)
    ff = jnp.dot(ff.astype(bf16), w2_ref[...], preferred_element_type=f32) + b2_ref[...]
    h2 = _batch_norm(h1 + ff, g2_ref[...], bt2_ref[...])

    h_vmem[...] = h2                       # carry to next layer (stays in VMEM)

    # ---- last grid step: node embeddings and graph embedding (node mean) ------
    @pl.when(layer == n_layers - 1)
    def _():
        hout = h2.reshape(B, N, D)
        h_out_ref[...] = hout
        mean_ref[...] = jnp.mean(hout, axis=1)


# ---------------------------------------------------------------------------
# Wrapper
# ---------------------------------------------------------------------------
def graph_attention_encoder(x, params, *, n_heads, key_dim):
    B, N, node_dim = x.shape
    D = params['init_w'].shape[1]
    layers = params['layers']
    L = len(layers)
    H, dk = n_heads, key_dim
    Hk = H * dk
    F = layers[0]['w1'].shape[1]
    R = B * N
    norm = 1.0 / math.sqrt(dk)
    bf16 = jnp.bfloat16

    # Pad node_dim to a multiple of 8 (non-degenerate MXU contraction depth).
    node_dim_p = max(8, ((node_dim + 7) // 8) * 8)
    pad = node_dim_p - node_dim
    x_p = jnp.pad(x, ((0, 0), (0, 0), (0, pad))) if pad else x
    iw_p = jnp.pad(params['init_w'], ((0, pad), (0, 0))) if pad else params['init_w']

    def stack(name):
        return jnp.stack([lp[name] for lp in layers], axis=0)

    # Per-layer weight slabs, stacked on a leading layer axis and streamed by
    # BlockSpec index_map(l).  Per-head (H, D, dk) projections are fused into
    # (D, H*dk) slabs.  Matmul weights bf16; biases / BN params f32.
    wq_s = (jnp.transpose(stack('wq'), (0, 2, 1, 3)).reshape(L, D, Hk) * norm).astype(bf16)
    wk_s = jnp.transpose(stack('wk'), (0, 2, 1, 3)).reshape(L, D, Hk).astype(bf16)
    wv_s = jnp.transpose(stack('wv'), (0, 2, 1, 3)).reshape(L, D, Hk).astype(bf16)
    wo_s = stack('wo').reshape(L, Hk, D).astype(bf16)    # head-major rows
    w1_s = stack('w1').astype(bf16)                      # (L, D, F)
    b1_s = stack('b1')                                   # (L, 1, F)
    w2_s = stack('w2').astype(bf16)                      # (L, F, D)
    b2_s = stack('b2')                                   # (L, 1, D)
    g1_s, bb1_s = stack('bn1_g'), stack('bn1_b')         # (L, 1, D)
    g2_s, bb2_s = stack('bn2_g'), stack('bn2_b')         # (L, 1, D)
    iw_b = iw_p.astype(bf16)                             # (node_dim_p, D)
    ib = params['init_b']                                # (1, D)

    def const_spec(shape):                 # same block every layer (not re-fetched)
        zeros = (0,) * len(shape)
        return pl.BlockSpec(shape, lambda l, z=zeros: z)

    def layer_spec(shape):                 # block l of a layer-stacked slab
        zeros = (0,) * len(shape)
        return pl.BlockSpec((None,) + shape, lambda l, z=zeros: (l,) + z)

    in_specs = [
        const_spec((B, N, node_dim_p)),    # x (padded)
        const_spec((node_dim_p, D)),       # init W (padded)
        const_spec((1, D)),                # init b
        layer_spec((D, Hk)),               # W_query fused (scaled)
        layer_spec((D, Hk)),               # W_key   fused
        layer_spec((D, Hk)),               # W_val   fused
        layer_spec((Hk, D)),               # W_out
        layer_spec((1, D)),                # BN1 gamma
        layer_spec((1, D)),                # BN1 beta
        layer_spec((D, F)),                # FF W1
        layer_spec((1, F)),                # FF b1
        layer_spec((F, D)),                # FF W2
        layer_spec((1, D)),                # FF b2
        layer_spec((1, D)),                # BN2 gamma
        layer_spec((1, D)),                # BN2 beta
    ]
    out_specs = (
        pl.BlockSpec((B, N, D), lambda l: (0, 0, 0)),
        pl.BlockSpec((B, D), lambda l: (0, 0)),
    )
    out_shape = (jax.ShapeDtypeStruct((B, N, D), jnp.float32),
                 jax.ShapeDtypeStruct((B, D), jnp.float32))

    inputs = (x_p, iw_b, ib, wq_s, wk_s, wv_s, wo_s, g1_s, bb1_s,
              w1_s, b1_s, w2_s, b2_s, g2_s, bb2_s)

    # VMEM scoped limit: ~3/4 of physical capacity (96 MiB-class on v5e/v6e,
    # ~48 MiB on v7x), with a conservative fallback if the query fails.
    try:
        cap = pltpu.get_tpu_info().vmem_capacity_bytes
        vmem_limit = int(min(cap * 3 // 4, 112 * 1024 * 1024))
    except Exception:
        vmem_limit = 48 * 1024 * 1024

    flops_per_layer = (2 * R * D * Hk * 3        # fused q/k/v projections
                       + 4 * B * H * N * N * dk  # scores + attn@V
                       + 2 * R * Hk * D          # output projection
                       + 4 * R * D * F)          # feed-forward
    cost = pl.CostEstimate(
        flops=int(L * flops_per_layer + 2 * R * node_dim_p * D),
        transcendentals=int(L * (B * H * N * N + 2 * R * D)),
        bytes_accessed=int(sum(a.size * a.dtype.itemsize for a in inputs)
                           + 4 * (B * N * D + B * D)),
    )

    kernel = functools.partial(encoder_kernel,
                               n_heads=H, key_dim=dk, n_layers=L)
    h, h_mean = pl.pallas_call(
        kernel,
        grid_spec=pltpu.PrefetchScalarGridSpec(
            num_scalar_prefetch=0,
            grid=(L,),                       # sequential layer loop; h stays in VMEM
            in_specs=in_specs,
            out_specs=out_specs,
            scratch_shapes=[pltpu.VMEM((R, D), jnp.float32),
                            pltpu.VMEM((R, Hk), jnp.bfloat16)]),
        out_shape=out_shape,
        compiler_params=pltpu.CompilerParams(
            dimension_semantics=("arbitrary",),
            vmem_limit_bytes=vmem_limit),
        cost_estimate=cost,
    )(*inputs)
    return h, h_mean


# ---------------------------------------------------------------------------
# Deterministic parameter init (mirrors the PyTorch module's shapes / ranges)
# ---------------------------------------------------------------------------
def init_params(key, *, node_dim, embed_dim, n_heads, n_layers, ff_hidden):
    dk = embed_dim // n_heads

    def uniform(k, shape, bound):
        return jax.random.uniform(k, shape, jnp.float32, -bound, bound)

    key, k_w, k_b = jax.random.split(key, 3)
    params = {
        'init_w': uniform(k_w, (node_dim, embed_dim), 1.0 / math.sqrt(node_dim)),
        'init_b': uniform(k_b, (1, embed_dim), 1.0 / math.sqrt(node_dim)),
        'layers': [],
    }
    for _ in range(n_layers):
        key, *ks = jax.random.split(key, 9)
        params['layers'].append({
            # PyTorch shapes: W_query/key/val (H, D, dk), W_out (H, dk, D)
            'wq': uniform(ks[0], (n_heads, embed_dim, dk), 1.0 / math.sqrt(dk)),
            'wk': uniform(ks[1], (n_heads, embed_dim, dk), 1.0 / math.sqrt(dk)),
            'wv': uniform(ks[2], (n_heads, embed_dim, dk), 1.0 / math.sqrt(dk)),
            'wo': uniform(ks[3], (n_heads, dk, embed_dim), 1.0 / math.sqrt(embed_dim)),
            # BatchNorm affine params (PyTorch defaults: weight=1, bias=0)
            'bn1_g': jnp.ones((1, embed_dim), jnp.float32),
            'bn1_b': jnp.zeros((1, embed_dim), jnp.float32),
            'bn2_g': jnp.ones((1, embed_dim), jnp.float32),
            'bn2_b': jnp.zeros((1, embed_dim), jnp.float32),
            # feed-forward Linear layers (stored as (in, out))
            'w1': uniform(ks[4], (embed_dim, ff_hidden), 1.0 / math.sqrt(embed_dim)),
            'b1': uniform(ks[5], (1, ff_hidden), 1.0 / math.sqrt(embed_dim)),
            'w2': uniform(ks[6], (ff_hidden, embed_dim), 1.0 / math.sqrt(ff_hidden)),
            'b2': uniform(ks[7], (1, embed_dim), 1.0 / math.sqrt(ff_hidden)),
        })
    return params


# ---------------------------------------------------------------------------
if __name__ == "__main__":
    # Small shapes consistent with the module: (batch, graph_size, node_dim)
    batch, graph_size, node_dim = 2, 16, 4
    embed_dim, n_heads, n_layers, ff_hidden = 32, 4, 2, 64
    key_dim = embed_dim // n_heads

    root = jax.random.PRNGKey(0)
    k_x, k_p = jax.random.split(root)
    x = jax.random.normal(k_x, (batch, graph_size, node_dim), jnp.float32)
    params = init_params(k_p, node_dim=node_dim, embed_dim=embed_dim,
                         n_heads=n_heads, n_layers=n_layers, ff_hidden=ff_hidden)

    h, h_mean = graph_attention_encoder(x, params, n_heads=n_heads, key_dim=key_dim)
    jax.block_until_ready((h, h_mean))

    assert h.shape == (batch, graph_size, embed_dim)
    assert h_mean.shape == (batch, embed_dim)
    assert bool(jnp.all(jnp.isfinite(h))) and bool(jnp.all(jnp.isfinite(h_mean)))
    print("KERNEL_OK")
</pallas_src>

<mosaic_0001>
module attributes {stable_mosaic.version = 11 : i64} {
  func.func @encoder_kernel(%arg0: i32, %arg1: memref<2x16x8xf32, #tpu.memory_space<vmem>>, %arg2: memref<8x32xbf16, #tpu.memory_space<vmem>>, %arg3: memref<1x32xf32, #tpu.memory_space<vmem>>, %arg4: memref<1x32x32xbf16, #tpu.memory_space<vmem>>, %arg5: memref<1x32x32xbf16, #tpu.memory_space<vmem>>, %arg6: memref<1x32x32xbf16, #tpu.memory_space<vmem>>, %arg7: memref<1x32x32xbf16, #tpu.memory_space<vmem>>, %arg8: memref<1x1x32xf32, #tpu.memory_space<vmem>>, %arg9: memref<1x1x32xf32, #tpu.memory_space<vmem>>, %arg10: memref<1x32x64xbf16, #tpu.memory_space<vmem>>, %arg11: memref<1x1x64xf32, #tpu.memory_space<vmem>>, %arg12: memref<1x64x32xbf16, #tpu.memory_space<vmem>>, %arg13: memref<1x1x32xf32, #tpu.memory_space<vmem>>, %arg14: memref<1x1x32xf32, #tpu.memory_space<vmem>>, %arg15: memref<1x1x32xf32, #tpu.memory_space<vmem>>, %arg16: memref<2x16x32xf32, #tpu.memory_space<vmem>>, %arg17: memref<2x32xf32, #tpu.memory_space<vmem>>, %arg18: memref<32x32xf32, #tpu.memory_space<vmem>>, %arg19: memref<32x32xbf16, #tpu.memory_space<vmem>>) attributes {dimension_semantics = [#tpu.dimension_semantics<arbitrary>], iteration_bounds = array<i64: 2>, scalar_prefetch = 0 : i64, scratch_operands = 2 : i64, tpu.core_type = #tpu.core_type<tc>, window_params = [{pipeline_mode = #tpu.pipeline_mode<synchronous>, transform_indices = @transform_0, window_bounds = array<i64: 2, 16, 8>}, {pipeline_mode = #tpu.pipeline_mode<synchronous>, transform_indices = @transform_1, window_bounds = array<i64: 8, 32>}, {pipeline_mode = #tpu.pipeline_mode<synchronous>, transform_indices = @transform_2, window_bounds = array<i64: 1, 32>}, {transform_indices = @transform_3, window_bounds = array<i64: 1, 32, 32>}, {transform_indices = @transform_4, window_bounds = array<i64: 1, 32, 32>}, {transform_indices = @transform_5, window_bounds = array<i64: 1, 32, 32>}, {transform_indices = @transform_6, window_bounds = array<i64: 1, 32, 32>}, {transform_indices = @transform_7, window_bounds = array<i64: 1, 1, 32>}, {transform_indices = @transform_8, window_bounds = array<i64: 1, 1, 32>}, {transform_indices = @transform_9, window_bounds = array<i64: 1, 32, 64>}, {transform_indices = @transform_10, window_bounds = array<i64: 1, 1, 64>}, {transform_indices = @transform_11, window_bounds = array<i64: 1, 64, 32>}, {transform_indices = @transform_12, window_bounds = array<i64: 1, 1, 32>}, {transform_indices = @transform_13, window_bounds = array<i64: 1, 1, 32>}, {transform_indices = @transform_14, window_bounds = array<i64: 1, 1, 32>}, {pipeline_mode = #tpu.pipeline_mode<synchronous>, transform_indices = @transform_15, window_bounds = array<i64: 2, 16, 32>}, {pipeline_mode = #tpu.pipeline_mode<synchronous>, transform_indices = @transform_16, window_bounds = array<i64: 2, 32>}]} {
    %c0_i32 = arith.constant 0 : i32
    %0 = arith.cmpi eq, %arg0, %c0_i32 : i32
    %1 = arith.extui %0 : i1 to i32
    %c0_i32_0 = arith.constant 0 : i32
    %2 = arith.cmpi ne, %1, %c0_i32_0 : i32
    scf.if %2 {
      %c0_80 = arith.constant 0 : index
      %c0_81 = arith.constant 0 : index
      %c0_82 = arith.constant 0 : index
      %181 = vector.load %arg1[%c0_80, %c0_81, %c0_82] : memref<2x16x8xf32, #tpu.memory_space<vmem>>, vector<2x16x8xf32>
      %182 = vector.shape_cast %181 : vector<2x16x8xf32> to vector<32x8xf32>
      %183 = arith.truncf %182 : vector<32x8xf32> to vector<32x8xbf16>
      %c0_83 = arith.constant 0 : index
      %c0_84 = arith.constant 0 : index
      %184 = vector.load %arg2[%c0_83, %c0_84] : memref<8x32xbf16, #tpu.memory_space<vmem>>, vector<8x32xbf16>
      %cst_85 = arith.constant dense<0.000000e+00> : vector<32x32xf32>
      %185 = tpu.matmul %183, %184, %cst_85 {dimension_numbers = #tpu.dot_dimension_numbers<[1], [0], [0], [1], [0, 0, 1, 1], [], []>} : vector<32x8xbf16>, vector<8x32xbf16>, vector<32x32xf32> -> vector<32x32xf32>
      %c0_86 = arith.constant 0 : index
      %c0_87 = arith.constant 0 : index
      %186 = vector.load %arg3[%c0_86, %c0_87] : memref<1x32xf32, #tpu.memory_space<vmem>>, vector<1x32xf32>
      %187 = vector.broadcast %186 : vector<1x32xf32> to vector<32x32xf32>
      %188 = arith.addf %185, %187 : vector<32x32xf32>
      %c0_88 = arith.constant 0 : index
      %c0_89 = arith.constant 0 : index
      %189 = vector.load %arg18[%c0_88, %c0_89] : memref<32x32xf32, #tpu.memory_space<vmem>>, vector<32x32xf32>
      tpu.vector_store %arg18[%c0_88, %c0_89], %188 {strides = array<i32>} : memref<32x32xf32, #tpu.memory_space<vmem>>, vector<32x32xf32>,
    } else {
    }
    %c0 = arith.constant 0 : index
    %c0_1 = arith.constant 0 : index
    %3 = vector.load %arg18[%c0, %c0_1] : memref<32x32xf32, #tpu.memory_space<vmem>>, vector<32x32xf32>
    %4 = arith.truncf %3 : vector<32x32xf32> to vector<32x32xbf16>
    %c0_2 = arith.constant 0 : index
    %c0_3 = arith.constant 0 : index
    %c0_4 = arith.constant 0 : index
    %5 = vector.load %arg4[%c0_2, %c0_3, %c0_4] : memref<1x32x32xbf16, #tpu.memory_space<vmem>>, vector<1x32x32xbf16>
    %6 = vector.shape_cast %5 : vector<1x32x32xbf16> to vector<32x32xbf16>
    %cst = arith.constant dense<0.000000e+00> : vector<32x32xf32>
    %7 = tpu.matmul %4, %6, %cst {dimension_numbers = #tpu.dot_dimension_numbers<[1], [0], [0], [1], [0, 0, 1, 1], [], []>} : vector<32x32xbf16>, vector<32x32xbf16>, vector<32x32xf32> -> vector<32x32xf32>
    %8 = arith.truncf %7 : vector<32x32xf32> to vector<32x32xbf16>
    %c0_5 = arith.constant 0 : index
    %c0_6 = arith.constant 0 : index
    %c0_7 = arith.constant 0 : index
    %9 = vector.load %arg5[%c0_5, %c0_6, %c0_7] : memref<1x32x32xbf16, #tpu.memory_space<vmem>>, vector<1x32x32xbf16>
    %10 = vector.shape_cast %9 : vector<1x32x32xbf16> to vector<32x32xbf16>
    %cst_8 = arith.constant dense<0.000000e+00> : vector<32x32xf32>
    %11 = tpu.matmul %4, %10, %cst_8 {dimension_numbers = #tpu.dot_dimension_numbers<[1], [0], [0], [1], [0, 0, 1, 1], [], []>} : vector<32x32xbf16>, vector<32x32xbf16>, vector<32x32xf32> -> vector<32x32xf32>
    %12 = arith.truncf %11 : vector<32x32xf32> to vector<32x32xbf16>
    %c0_9 = arith.constant 0 : index
    %c0_10 = arith.constant 0 : index
    %c0_11 = arith.constant 0 : index
    %13 = vector.load %arg6[%c0_9, %c0_10, %c0_11] : memref<1x32x32xbf16, #tpu.memory_space<vmem>>, vector<1x32x32xbf16>
    %14 = vector.shape_cast %13 : vector<1x32x32xbf16> to vector<32x32xbf16>
    %cst_12 = arith.constant dense<0.000000e+00> : vector<32x32xf32>
    %15 = tpu.matmul %4, %14, %cst_12 {dimension_numbers = #tpu.dot_dimension_numbers<[1], [0], [0], [1], [0, 0, 1, 1], [], []>} : vector<32x32xbf16>, vector<32x32xbf16>, vector<32x32xf32> -> vector<32x32xf32>
    %16 = arith.truncf %15 : vector<32x32xf32> to vector<32x32xbf16>
    %17 = vector.extract_strided_slice %8 {offsets = [0, 0], sizes = [32, 8], strides = [1, 1]} : vector<32x32xbf16> to vector<32x8xbf16>
    %18 = vector.shape_cast %17 : vector<32x8xbf16> to vector<2x16x8xbf16>
    %19 = vector.extract_strided_slice %12 {offsets = [0, 0], sizes = [32, 8], strides = [1, 1]} : vector<32x32xbf16> to vector<32x8xbf16>
    %20 = vector.shape_cast %19 : vector<32x8xbf16> to vector<2x16x8xbf16>
    %21 = vector.extract_strided_slice %16 {offsets = [0, 0], sizes = [32, 8], strides = [1, 1]} : vector<32x32xbf16> to vector<32x8xbf16>
    %22 = vector.shape_cast %21 : vector<32x8xbf16> to vector<2x16x8xbf16>
    "tpu.trace_start"() <{level = 10 : i32, message = "bnd,bmd->bnm"}> : () -> ()
    %cst_13 = arith.constant dense<0.000000e+00> : vector<2x16x16xf32>
    %23 = tpu.matmul %18, %20, %cst_13 {dimension_numbers = #tpu.dot_dimension_numbers<[2], [2], [1], [1], [0, 0, 0, 1, 1, 1], [0], [0]>} : vector<2x16x8xbf16>, vector<2x16x8xbf16>, vector<2x16x16xf32> -> vector<2x16x16xf32>
    "tpu.trace_stop"() : () -> ()
    %cst_14 = arith.constant dense<0xFF800000> : vector<2x16xf32>
    %24 = vector.multi_reduction <maximumf>, %23, %cst_14 [2] : vector<2x16x16xf32> to vector<2x16xf32>
    %25 = vector.shape_cast %24 : vector<2x16xf32> to vector<2x16x1xf32>
    %26 = vector.broadcast %25 : vector<2x16x1xf32> to vector<2x16x16xf32>
    %27 = arith.subf %23, %26 : vector<2x16x16xf32>
    %28 = math.exp %27 : vector<2x16x16xf32>
    %cst_15 = arith.constant dense<0.000000e+00> : vector<2x16xf32>
    %29 = vector.multi_reduction <add>, %28, %cst_15 [2] : vector<2x16x16xf32> to vector<2x16xf32>
    %30 = vector.shape_cast %29 : vector<2x16xf32> to vector<2x16x1xf32>
    %31 = tpu.reciprocal %30 {approx = true} : vector<2x16x1xf32> -> vector<2x16x1xf32>
    %32 = vector.broadcast %31 : vector<2x16x1xf32> to vector<2x16x16xf32>
    %33 = arith.mulf %28, %32 : vector<2x16x16xf32>
    %34 = arith.truncf %33 : vector<2x16x16xf32> to vector<2x16x16xbf16>
    "tpu.trace_start"() <{level = 10 : i32, message = "bnm,bmd->bnd"}> : () -> ()
    %cst_16 = arith.constant dense<0.000000e+00> : vector<2x16x8xf32>
    %35 = tpu.matmul %34, %22, %cst_16 {dimension_numbers = #tpu.dot_dimension_numbers<[2], [1], [1], [2], [0, 0, 0, 1, 1, 2], [0], [0]>} : vector<2x16x16xbf16>, vector<2x16x8xbf16>, vector<2x16x8xf32> -> vector<2x16x8xf32>
    "tpu.trace_stop"() : () -> ()
    %36 = arith.truncf %35 : vector<2x16x8xf32> to vector<2x16x8xbf16>
    %37 = vector.shape_cast %36 : vector<2x16x8xbf16> to vector<32x8xbf16>
    %c0_17 = arith.constant 0 : index
    %c0_18 = arith.constant 0 : index
    %38 = vector.load %arg19[%c0_17, %c0_18] : memref<32x32xbf16, #tpu.memory_space<vmem>>, vector<32x8xbf16>
    tpu.vector_store %arg19[%c0_17, %c0_18], %37 {strides = array<i32>} : memref<32x32xbf16, #tpu.memory_space<vmem>>, vector<32x8xbf16>,
    %39 = vector.extract_strided_slice %8 {offsets = [0, 8], sizes = [32, 8], strides = [1, 1]} : vector<32x32xbf16> to vector<32x8xbf16>
    %40 = vector.shape_cast %39 : vector<32x8xbf16> to vector<2x16x8xbf16>
    %41 = vector.extract_strided_slice %12 {offsets = [0, 8], sizes = [32, 8], strides = [1, 1]} : vector<32x32xbf16> to vector<32x8xbf16>
    %42 = vector.shape_cast %41 : vector<32x8xbf16> to vector<2x16x8xbf16>
    %43 = vector.extract_strided_slice %16 {offsets = [0, 8], sizes = [32, 8], strides = [1, 1]} : vector<32x32xbf16> to vector<32x8xbf16>
    %44 = vector.shape_cast %43 : vector<32x8xbf16> to vector<2x16x8xbf16>
    "tpu.trace_start"() <{level = 10 : i32, message = "bnd,bmd->bnm"}> : () -> ()
    %cst_19 = arith.constant dense<0.000000e+00> : vector<2x16x16xf32>
    %45 = tpu.matmul %40, %42, %cst_19 {dimension_numbers = #tpu.dot_dimension_numbers<[2], [2], [1], [1], [0, 0, 0, 1, 1, 1], [0], [0]>} : vector<2x16x8xbf16>, vector<2x16x8xbf16>, vector<2x16x16xf32> -> vector<2x16x16xf32>
    "tpu.trace_stop"() : () -> ()
    %cst_20 = arith.constant dense<0xFF800000> : vector<2x16xf32>
    %46 = vector.multi_reduction <maximumf>, %45, %cst_20 [2] : vector<2x16x16xf32> to vector<2x16xf32>
    %47 = vector.shape_cast %46 : vector<2x16xf32> to vector<2x16x1xf32>
    %48 = vector.broadcast %47 : vector<2x16x1xf32> to vector<2x16x16xf32>
    %49 = arith.subf %45, %48 : vector<2x16x16xf32>
    %50 = math.exp %49 : vector<2x16x16xf32>
    %cst_21 = arith.constant dense<0.000000e+00> : vector<2x16xf32>
    %51 = vector.multi_reduction <add>, %50, %cst_21 [2] : vector<2x16x16xf32> to vector<2x16xf32>
    %52 = vector.shape_cast %51 : vector<2x16xf32> to vector<2x16x1xf32>
    %53 = tpu.reciprocal %52 {approx = true} : vector<2x16x1xf32> -> vector<2x16x1xf32>
    %54 = vector.broadcast %53 : vector<2x16x1xf32> to vector<2x16x16xf32>
    %55 = arith.mulf %50, %54 : vector<2x16x16xf32>
    %56 = arith.truncf %55 : vector<2x16x16xf32> to vector<2x16x16xbf16>
    "tpu.trace_start"() <{level = 10 : i32, message = "bnm,bmd->bnd"}> : () -> ()
    %cst_22 = arith.constant dense<0.000000e+00> : vector<2x16x8xf32>
    %57 = tpu.matmul %56, %44, %cst_22 {dimension_numbers = #tpu.dot_dimension_numbers<[2], [1], [1], [2], [0, 0, 0, 1, 1, 2], [0], [0]>} : vector<2x16x16xbf16>, vector<2x16x8xbf16>, vector<2x16x8xf32> -> vector<2x16x8xf32>
    "tpu.trace_stop"() : () -> ()
    %58 = arith.truncf %57 : vector<2x16x8xf32> to vector<2x16x8xbf16>
    %59 = vector.shape_cast %58 : vector<2x16x8xbf16> to vector<32x8xbf16>
    %c0_23 = arith.constant 0 : index
    %c8 = arith.constant 8 : index
    %60 = vector.load %arg19[%c0_23, %c8] : memref<32x32xbf16, #tpu.memory_space<vmem>>, vector<32x8xbf16>
    tpu.vector_store %arg19[%c0_23, %c8], %59 {strides = array<i32>} : memref<32x32xbf16, #tpu.memory_space<vmem>>, vector<32x8xbf16>,
    %61 = vector.extract_strided_slice %8 {offsets = [0, 16], sizes = [32, 8], strides = [1, 1]} : vector<32x32xbf16> to vector<32x8xbf16>
    %62 = vector.shape_cast %61 : vector<32x8xbf16> to vector<2x16x8xbf16>
    %63 = vector.extract_strided_slice %12 {offsets = [0, 16], sizes = [32, 8], strides = [1, 1]} : vector<32x32xbf16> to vector<32x8xbf16>
    %64 = vector.shape_cast %63 : vector<32x8xbf16> to vector<2x16x8xbf16>
    %65 = vector.extract_strided_slice %16 {offsets = [0, 16], sizes = [32, 8], strides = [1, 1]} : vector<32x32xbf16> to vector<32x8xbf16>
    %66 = vector.shape_cast %65 : vector<32x8xbf16> to vector<2x16x8xbf16>
    "tpu.trace_start"() <{level = 10 : i32, message = "bnd,bmd->bnm"}> : () -> ()
    %cst_24 = arith.constant dense<0.000000e+00> : vector<2x16x16xf32>
    %67 = tpu.matmul %62, %64, %cst_24 {dimension_numbers = #tpu.dot_dimension_numbers<[2], [2], [1], [1], [0, 0, 0, 1, 1, 1], [0], [0]>} : vector<2x16x8xbf16>, vector<2x16x8xbf16>, vector<2x16x16xf32> -> vector<2x16x16xf32>
    "tpu.trace_stop"() : () -> ()
    %cst_25 = arith.constant dense<0xFF800000> : vector<2x16xf32>
    %68 = vector.multi_reduction <maximumf>, %67, %cst_25 [2] : vector<2x16x16xf32> to vector<2x16xf32>
    %69 = vector.shape_cast %68 : vector<2x16xf32> to vector<2x16x1xf32>
    %70 = vector.broadcast %69 : vector<2x16x1xf32> to vector<2x16x16xf32>
    %71 = arith.subf %67, %70 : vector<2x16x16xf32>
    %72 = math.exp %71 : vector<2x16x16xf32>
    %cst_26 = arith.constant dense<0.000000e+00> : vector<2x16xf32>
    %73 = vector.multi_reduction <add>, %72, %cst_26 [2] : vector<2x16x16xf32> to vector<2x16xf32>
    %74 = vector.shape_cast %73 : vector<2x16xf32> to vector<2x16x1xf32>
    %75 = tpu.reciprocal %74 {approx = true} : vector<2x16x1xf32> -> vector<2x16x1xf32>
    %76 = vector.broadcast %75 : vector<2x16x1xf32> to vector<2x16x16xf32>
    %77 = arith.mulf %72, %76 : vector<2x16x16xf32>
    %78 = arith.truncf %77 : vector<2x16x16xf32> to vector<2x16x16xbf16>
    "tpu.trace_start"() <{level = 10 : i32, message = "bnm,bmd->bnd"}> : () -> ()
    %cst_27 = arith.constant dense<0.000000e+00> : vector<2x16x8xf32>
    %79 = tpu.matmul %78, %66, %cst_27 {dimension_numbers = #tpu.dot_dimension_numbers<[2], [1], [1], [2], [0, 0, 0, 1, 1, 2], [0], [0]>} : vector<2x16x16xbf16>, vector<2x16x8xbf16>, vector<2x16x8xf32> -> vector<2x16x8xf32>
    "tpu.trace_stop"() : () -> ()
    %80 = arith.truncf %79 : vector<2x16x8xf32> to vector<2x16x8xbf16>
    %81 = vector.shape_cast %80 : vector<2x16x8xbf16> to vector<32x8xbf16>
    %c0_28 = arith.constant 0 : index
    %c16 = arith.constant 16 : index
    %82 = vector.load %arg19[%c0_28, %c16] : memref<32x32xbf16, #tpu.memory_space<vmem>>, vector<32x8xbf16>
    tpu.vector_store %arg19[%c0_28, %c16], %81 {strides = array<i32>} : memref<32x32xbf16, #tpu.memory_space<vmem>>, vector<32x8xbf16>,
    %83 = vector.extract_strided_slice %8 {offsets = [0, 24], sizes = [32, 8], strides = [1, 1]} : vector<32x32xbf16> to vector<32x8xbf16>
    %84 = vector.shape_cast %83 : vector<32x8xbf16> to vector<2x16x8xbf16>
    %85 = vector.extract_strided_slice %12 {offsets = [0, 24], sizes = [32, 8], strides = [1, 1]} : vector<32x32xbf16> to vector<32x8xbf16>
    %86 = vector.shape_cast %85 : vector<32x8xbf16> to vector<2x16x8xbf16>
    %87 = vector.extract_strided_slice %16 {offsets = [0, 24], sizes = [32, 8], strides = [1, 1]} : vector<32x32xbf16> to vector<32x8xbf16>
    %88 = vector.shape_cast %87 : vector<32x8xbf16> to vector<2x16x8xbf16>
    "tpu.trace_start"() <{level = 10 : i32, message = "bnd,bmd->bnm"}> : () -> ()
    %cst_29 = arith.constant dense<0.000000e+00> : vector<2x16x16xf32>
    %89 = tpu.matmul %84, %86, %cst_29 {dimension_numbers = #tpu.dot_dimension_numbers<[2], [2], [1], [1], [0, 0, 0, 1, 1, 1], [0], [0]>} : vector<2x16x8xbf16>, vector<2x16x8xbf16>, vector<2x16x16xf32> -> vector<2x16x16xf32>
    "tpu.trace_stop"() : () -> ()
    %cst_30 = arith.constant dense<0xFF800000> : vector<2x16xf32>
    %90 = vector.multi_reduction <maximumf>, %89, %cst_30 [2] : vector<2x16x16xf32> to vector<2x16xf32>
    %91 = vector.shape_cast %90 : vector<2x16xf32> to vector<2x16x1xf32>
    %92 = vector.broadcast %91 : vector<2x16x1xf32> to vector<2x16x16xf32>
    %93 = arith.subf %89, %92 : vector<2x16x16xf32>
    %94 = math.exp %93 : vector<2x16x16xf32>
    %cst_31 = arith.constant dense<0.000000e+00> : vector<2x16xf32>
    %95 = vector.multi_reduction <add>, %94, %cst_31 [2] : vector<2x16x16xf32> to vector<2x16xf32>
    %96 = vector.shape_cast %95 : vector<2x16xf32> to vector<2x16x1xf32>
    %97 = tpu.reciprocal %96 {approx = true} : vector<2x16x1xf32> -> vector<2x16x1xf32>
    %98 = vector.broadcast %97 : vector<2x16x1xf32> to vector<2x16x16xf32>
    %99 = arith.mulf %94, %98 : vector<2x16x16xf32>
    %100 = arith.truncf %99 : vector<2x16x16xf32> to vector<2x16x16xbf16>
    "tpu.trace_start"() <{level = 10 : i32, message = "bnm,bmd->bnd"}> : () -> ()
    %cst_32 = arith.constant dense<0.000000e+00> : vector<2x16x8xf32>
    %101 = tpu.matmul %100, %88, %cst_32 {dimension_numbers = #tpu.dot_dimension_numbers<[2], [1], [1], [2], [0, 0, 0, 1, 1, 2], [0], [0]>} : vector<2x16x16xbf16>, vector<2x16x8xbf16>, vector<2x16x8xf32> -> vector<2x16x8xf32>
    "tpu.trace_stop"() : () -> ()
    %102 = arith.truncf %101 : vector<2x16x8xf32> to vector<2x16x8xbf16>
    %103 = vector.shape_cast %102 : vector<2x16x8xbf16> to vector<32x8xbf16>
    %c0_33 = arith.constant 0 : index
    %c24 = arith.constant 24 : index
    %104 = vector.load %arg19[%c0_33, %c24] : memref<32x32xbf16, #tpu.memory_space<vmem>>, vector<32x8xbf16>
    tpu.vector_store %arg19[%c0_33, %c24], %103 {strides = array<i32>} : memref<32x32xbf16, #tpu.memory_space<vmem>>, vector<32x8xbf16>,
    %c0_34 = arith.constant 0 : index
    %c0_35 = arith.constant 0 : index
    %105 = vector.load %arg19[%c0_34, %c0_35] : memref<32x32xbf16, #tpu.memory_space<vmem>>, vector<32x32xbf16>
    %c0_36 = arith.constant 0 : index
    %c0_37 = arith.constant 0 : index
    %c0_38 = arith.constant 0 : index
    %106 = vector.load %arg7[%c0_36, %c0_37, %c0_38] : memref<1x32x32xbf16, #tpu.memory_space<vmem>>, vector<1x32x32xbf16>
    %107 = vector.shape_cast %106 : vector<1x32x32xbf16> to vector<32x32xbf16>
    %cst_39 = arith.constant dense<0.000000e+00> : vector<32x32xf32>
    %108 = tpu.matmul %105, %107, %cst_39 {dimension_numbers = #tpu.dot_dimension_numbers<[1], [0], [0], [1], [0, 0, 1, 1], [], []>} : vector<32x32xbf16>, vector<32x32xbf16>, vector<32x32xf32> -> vector<32x32xf32>
    %109 = arith.addf %3, %108 : vector<32x32xf32>
    %c0_40 = arith.constant 0 : index
    %c0_41 = arith.constant 0 : index
    %c0_42 = arith.constant 0 : index
    %110 = vector.load %arg8[%c0_40, %c0_41, %c0_42] : memref<1x1x32xf32, #tpu.memory_space<vmem>>, vector<1x1x32xf32>
    %111 = vector.shape_cast %110 : vector<1x1x32xf32> to vector<1x32xf32>
    %c0_43 = arith.constant 0 : index
    %c0_44 = arith.constant 0 : index
    %c0_45 = arith.constant 0 : index
    %112 = vector.load %arg9[%c0_43, %c0_44, %c0_45] : memref<1x1x32xf32, #tpu.memory_space<vmem>>, vector<1x1x32xf32>
    %113 = vector.shape_cast %112 : vector<1x1x32xf32> to vector<1x32xf32>
    %cst_46 = arith.constant dense<0.000000e+00> : vector<32xf32>
    %114 = vector.multi_reduction <add>, %109, %cst_46 [0] : vector<32x32xf32> to vector<32xf32>
    %115 = vector.shape_cast %114 : vector<32xf32> to vector<1x32xf32>
    %cst_47 = arith.constant 3.125000e-02 : f32
    %116 = vector.broadcast %cst_47 : f32 to vector<1x32xf32>
    %117 = arith.mulf %115, %116 : vector<1x32xf32>
    %118 = vector.broadcast %117 : vector<1x32xf32> to vector<32x32xf32>
    %119 = arith.subf %109, %118 : vector<32x32xf32>
    %120 = arith.mulf %119, %119 : vector<32x32xf32>
    %cst_48 = arith.constant dense<0.000000e+00> : vector<32xf32>
    %121 = vector.multi_reduction <add>, %120, %cst_48 [0] : vector<32x32xf32> to vector<32xf32>
    %122 = vector.shape_cast %121 : vector<32xf32> to vector<1x32xf32>
    %cst_49 = arith.constant 3.125000e-02 : f32
    %123 = vector.broadcast %cst_49 : f32 to vector<1x32xf32>
    %124 = arith.mulf %122, %123 : vector<1x32xf32>
    %cst_50 = arith.constant 9.99999974E-6 : f32
    %125 = vector.broadcast %cst_50 : f32 to vector<1x32xf32>
    %126 = arith.addf %124, %125 : vector<1x32xf32>
    %127 = math.rsqrt %126 : vector<1x32xf32>
    %128 = vector.broadcast %127 : vector<1x32xf32> to vector<32x32xf32>
    %129 = arith.mulf %119, %128 : vector<32x32xf32>
    %130 = vector.broadcast %111 : vector<1x32xf32> to vector<32x32xf32>
    %131 = arith.mulf %129, %130 : vector<32x32xf32>
    %132 = vector.broadcast %113 : vector<1x32xf32> to vector<32x32xf32>
    %133 = arith.addf %131, %132 : vector<32x32xf32>
    %134 = arith.truncf %133 : vector<32x32xf32> to vector<32x32xbf16>
    %c0_51 = arith.constant 0 : index
    %c0_52 = arith.constant 0 : index
    %c0_53 = arith.constant 0 : index
    %135 = vector.load %arg10[%c0_51, %c0_52, %c0_53] : memref<1x32x64xbf16, #tpu.memory_space<vmem>>, vector<1x32x64xbf16>
    %136 = vector.shape_cast %135 : vector<1x32x64xbf16> to vector<32x64xbf16>
    %cst_54 = arith.constant dense<0.000000e+00> : vector<32x64xf32>
    %137 = tpu.matmul %134, %136, %cst_54 {dimension_numbers = #tpu.dot_dimension_numbers<[1], [0], [0], [1], [0, 0, 1, 1], [], []>} : vector<32x32xbf16>, vector<32x64xbf16>, vector<32x64xf32> -> vector<32x64xf32>
    %c0_55 = arith.constant 0 : index
    %c0_56 = arith.constant 0 : index
    %c0_57 = arith.constant 0 : index
    %138 = vector.load %arg11[%c0_55, %c0_56, %c0_57] : memref<1x1x64xf32, #tpu.memory_space<vmem>>, vector<1x1x64xf32>
    %139 = vector.shape_cast %138 : vector<1x1x64xf32> to vector<1x64xf32>
    %140 = vector.broadcast %139 : vector<1x64xf32> to vector<32x64xf32>
    %141 = arith.addf %137, %140 : vector<32x64xf32>
    %cst_58 = arith.constant 0.000000e+00 : f32
    %142 = vector.broadcast %cst_58 : f32 to vector<32x64xf32>
    %143 = arith.maximumf %141, %142 : vector<32x64xf32>
    %144 = arith.truncf %143 : vector<32x64xf32> to vector<32x64xbf16>
    %c0_59 = arith.constant 0 : index
    %c0_60 = arith.constant 0 : index
    %c0_61 = arith.constant 0 : index
    %145 = vector.load %arg12[%c0_59, %c0_60, %c0_61] : memref<1x64x32xbf16, #tpu.memory_space<vmem>>, vector<1x64x32xbf16>
    %146 = vector.shape_cast %145 : vector<1x64x32xbf16> to vector<64x32xbf16>
    %cst_62 = arith.constant dense<0.000000e+00> : vector<32x32xf32>
    %147 = tpu.matmul %144, %146, %cst_62 {dimension_numbers = #tpu.dot_dimension_numbers<[1], [0], [0], [1], [0, 0, 1, 1], [], []>} : vector<32x64xbf16>, vector<64x32xbf16>, vector<32x32xf32> -> vector<32x32xf32>
    %c0_63 = arith.constant 0 : index
    %c0_64 = arith.constant 0 : index
    %c0_65 = arith.constant 0 : index
    %148 = vector.load %arg13[%c0_63, %c0_64, %c0_65] : memref<1x1x32xf32, #tpu.memory_space<vmem>>, vector<1x1x32xf32>
    %149 = vector.shape_cast %148 : vector<1x1x32xf32> to vector<1x32xf32>
    %150 = vector.broadcast %149 : vector<1x32xf32> to vector<32x32xf32>
    %151 = arith.addf %147, %150 : vector<32x32xf32>
    %152 = arith.addf %133, %151 : vector<32x32xf32>
    %c0_66 = arith.constant 0 : index
    %c0_67 = arith.constant 0 : index
    %c0_68 = arith.constant 0 : index
    %153 = vector.load %arg14[%c0_66, %c0_67, %c0_68] : memref<1x1x32xf32, #tpu.memory_space<vmem>>, vector<1x1x32xf32>
    %154 = vector.shape_cast %153 : vector<1x1x32xf32> to vector<1x32xf32>
    %c0_69 = arith.constant 0 : index
    %c0_70 = arith.constant 0 : index
    %c0_71 = arith.constant 0 : index
    %155 = vector.load %arg15[%c0_69, %c0_70, %c0_71] : memref<1x1x32xf32, #tpu.memory_space<vmem>>, vector<1x1x32xf32>
    %156 = vector.shape_cast %155 : vector<1x1x32xf32> to vector<1x32xf32>
    %cst_72 = arith.constant dense<0.000000e+00> : vector<32xf32>
    %157 = vector.multi_reduction <add>, %152, %cst_72 [0] : vector<32x32xf32> to vector<32xf32>
    %158 = vector.shape_cast %157 : vector<32xf32> to vector<1x32xf32>
    %cst_73 = arith.constant 3.125000e-02 : f32
    %159 = vector.broadcast %cst_73 : f32 to vector<1x32xf32>
    %160 = arith.mulf %158, %159 : vector<1x32xf32>
    %161 = vector.broadcast %160 : vector<1x32xf32> to vector<32x32xf32>
    %162 = arith.subf %152, %161 : vector<32x32xf32>
    %163 = arith.mulf %162, %162 : vector<32x32xf32>
    %cst_74 = arith.constant dense<0.000000e+00> : vector<32xf32>
    %164 = vector.multi_reduction <add>, %163, %cst_74 [0] : vector<32x32xf32> to vector<32xf32>
    %165 = vector.shape_cast %164 : vector<32xf32> to vector<1x32xf32>
    %cst_75 = arith.constant 3.125000e-02 : f32
    %166 = vector.broadcast %cst_75 : f32 to vector<1x32xf32>
    %167 = arith.mulf %165, %166 : vector<1x32xf32>
    %cst_76 = arith.constant 9.99999974E-6 : f32
    %168 = vector.broadcast %cst_76 : f32 to vector<1x32xf32>
    %169 = arith.addf %167, %168 : vector<1x32xf32>
    %170 = math.rsqrt %169 : vector<1x32xf32>
    %171 = vector.broadcast %170 : vector<1x32xf32> to vector<32x32xf32>
    %172 = arith.mulf %162, %171 : vector<32x32xf32>
    %173 = vector.broadcast %154 : vector<1x32xf32> to vector<32x32xf32>
    %174 = arith.mulf %172, %173 : vector<32x32xf32>
    %175 = vector.broadcast %156 : vector<1x32xf32> to vector<32x32xf32>
    %176 = arith.addf %174, %175 : vector<32x32xf32>
    %c0_77 = arith.constant 0 : index
    %c0_78 = arith.constant 0 : index
    %177 = vector.load %arg18[%c0_77, %c0_78] : memref<32x32xf32, #tpu.memory_space<vmem>>, vector<32x32xf32>
    tpu.vector_store %arg18[%c0_77, %c0_78], %176 {strides = array<i32>} : memref<32x32xf32, #tpu.memory_space<vmem>>, vector<32x32xf32>,
    %c1_i32 = arith.constant 1 : i32
    %178 = arith.cmpi eq, %arg0, %c1_i32 : i32
    %179 = arith.extui %178 : i1 to i32
    %c0_i32_79 = arith.constant 0 : i32
    %180 = arith.cmpi ne, %179, %c0_i32_79 : i32
    scf.if %180 {
      %181 = vector.shape_cast %176 : vector<32x32xf32> to vector<2x16x32xf32>
      %c0_80 = arith.constant 0 : index
      %c0_81 = arith.constant 0 : index
      %c0_82 = arith.constant 0 : index
      %182 = vector.load %arg16[%c0_80, %c0_81, %c0_82] : memref<2x16x32xf32, #tpu.memory_space<vmem>>, vector<2x16x32xf32>
      tpu.vector_store %arg16[%c0_80, %c0_81, %c0_82], %181 {strides = array<i32>} : memref<2x16x32xf32, #tpu.memory_space<vmem>>, vector<2x16x32xf32>,
      %cst_83 = arith.constant dense<0.000000e+00> : vector<2x32xf32>
      %183 = vector.multi_reduction <add>, %181, %cst_83 [1] : vector<2x16x32xf32> to vector<2x32xf32>
      %cst_84 = arith.constant 1.600000e+01 : f32
      %184 = vector.broadcast %cst_84 : f32 to vector<2x32xf32>
      %185 = arith.divf %183, %184 : vector<2x32xf32>
      %c0_85 = arith.constant 0 : index
      %c0_86 = arith.constant 0 : index
      %186 = vector.load %arg17[%c0_85, %c0_86] : memref<2x32xf32, #tpu.memory_space<vmem>>, vector<2x32xf32>
      tpu.vector_store %arg17[%c0_85, %c0_86], %185 {strides = array<i32>} : memref<2x32xf32, #tpu.memory_space<vmem>>, vector<2x32xf32>,
    } else {
    }
    return
  }
  func.func @transform_0(%arg0: i32) -> (i32, i32, i32) {
    %c0_i32 = arith.constant 0 : i32
    %c0_i32_0 = arith.constant 0 : i32
    %c0_i32_1 = arith.constant 0 : i32
    %c0_i32_2 = arith.constant 0 : i32
    return %c0_i32, %c0_i32_0, %c0_i32_1 : i32, i32, i32
  }
  func.func @transform_1(%arg0: i32) -> (i32, i32) {
    %c0_i32 = arith.constant 0 : i32
    %c0_i32_0 = arith.constant 0 : i32
    %c0_i32_1 = arith.constant 0 : i32
    return %c0_i32, %c0_i32_0 : i32, i32
  }
  func.func @transform_2(%arg0: i32) -> (i32, i32) {
    %c0_i32 = arith.constant 0 : i32
    %c0_i32_0 = arith.constant 0 : i32
    %c0_i32_1 = arith.constant 0 : i32
    return %c0_i32, %c0_i32_0 : i32, i32
  }
  func.func @transform_3(%arg0: i32) -> (i32, i32, i32) {
    %c0_i32 = arith.constant 0 : i32
    %c0_i32_0 = arith.constant 0 : i32
    %c0_i32_1 = arith.constant 0 : i32
    return %arg0, %c0_i32, %c0_i32_0 : i32, i32, i32
  }
  func.func @transform_4(%arg0: i32) -> (i32, i32, i32) {
    %c0_i32 = arith.constant 0 : i32
    %c0_i32_0 = arith.constant 0 : i32
    %c0_i32_1 = arith.constant 0 : i32
    return %arg0, %c0_i32, %c0_i32_0 : i32, i32, i32
  }
  func.func @transform_5(%arg0: i32) -> (i32, i32, i32) {
    %c0_i32 = arith.constant 0 : i32
    %c0_i32_0 = arith.constant 0 : i32
    %c0_i32_1 = arith.constant 0 : i32
    return %arg0, %c0_i32, %c0_i32_0 : i32, i32, i32
  }
  func.func @transform_6(%arg0: i32) -> (i32, i32, i32) {
    %c0_i32 = arith.constant 0 : i32
    %c0_i32_0 = arith.constant 0 : i32
    %c0_i32_1 = arith.constant 0 : i32
    return %arg0, %c0_i32, %c0_i32_0 : i32, i32, i32
  }
  func.func @transform_7(%arg0: i32) -> (i32, i32, i32) {
    %c0_i32 = arith.constant 0 : i32
    %c0_i32_0 = arith.constant 0 : i32
    %c0_i32_1 = arith.constant 0 : i32
    return %arg0, %c0_i32, %c0_i32_0 : i32, i32, i32
  }
  func.func @transform_8(%arg0: i32) -> (i32, i32, i32) {
    %c0_i32 = arith.constant 0 : i32
    %c0_i32_0 = arith.constant 0 : i32
    %c0_i32_1 = arith.constant 0 : i32
    return %arg0, %c0_i32, %c0_i32_0 : i32, i32, i32
  }
  func.func @transform_9(%arg0: i32) -> (i32, i32, i32) {
    %c0_i32 = arith.constant 0 : i32
    %c0_i32_0 = arith.constant 0 : i32
    %c0_i32_1 = arith.constant 0 : i32
    return %arg0, %c0_i32, %c0_i32_0 : i32, i32, i32
  }
  func.func @transform_10(%arg0: i32) -> (i32, i32, i32) {
    %c0_i32 = arith.constant 0 : i32
    %c0_i32_0 = arith.constant 0 : i32
    %c0_i32_1 = arith.constant 0 : i32
    return %arg0, %c0_i32, %c0_i32_0 : i32, i32, i32
  }
  func.func @transform_11(%arg0: i32) -> (i32, i32, i32) {
    %c0_i32 = arith.constant 0 : i32
    %c0_i32_0 = arith.constant 0 : i32
    %c0_i32_1 = arith.constant 0 : i32
    return %arg0, %c0_i32, %c0_i32_0 : i32, i32, i32
  }
  func.func @transform_12(%arg0: i32) -> (i32, i32, i32) {
    %c0_i32 = arith.constant 0 : i32
    %c0_i32_0 = arith.constant 0 : i32
    %c0_i32_1 = arith.constant 0 : i32
    return %arg0, %c0_i32, %c0_i32_0 : i32, i32, i32
  }
  func.func @transform_13(%arg0: i32) -> (i32, i32, i32) {
    %c0_i32 = arith.constant 0 : i32
    %c0_i32_0 = arith.constant 0 : i32
    %c0_i32_1 = arith.constant 0 : i32
    return %arg0, %c0_i32, %c0_i32_0 : i32, i32, i32
  }
  func.func @transform_14(%arg0: i32) -> (i32, i32, i32) {
    %c0_i32 = arith.constant 0 : i32
    %c0_i32_0 = arith.constant 0 : i32
    %c0_i32_1 = arith.constant 0 : i32
    return %arg0, %c0_i32, %c0_i32_0 : i32, i32, i32
  }
  func.func @transform_15(%arg0: i32) -> (i32, i32, i32) {
    %c0_i32 = arith.constant 0 : i32
    %c0_i32_0 = arith.constant 0 : i32
    %c0_i32_1 = arith.constant 0 : i32
    %c0_i32_2 = arith.constant 0 : i32
    return %c0_i32, %c0_i32_0, %c0_i32_1 : i32, i32, i32
  }
  func.func @transform_16(%arg0: i32) -> (i32, i32) {
    %c0_i32 = arith.constant 0 : i32
    %c0_i32_0 = arith.constant 0 : i32
    %c0_i32_1 = arith.constant 0 : i32
    return %c0_i32, %c0_i32_0 : i32, i32
  }
}

</mosaic_0001>

<bundles_post_ra>
// kernel: tpu_custom_call.1
= control target key start
LH: loop header
LB: loop body
LE: loop exit
PB: predicated region body
PF: predicated region fallthrough
CT: control target
= control target key end

     0   :  { %s4019_s0 = inlined_call_operand.vmem [shape: f32[2,16,8], index: 0, kind: input, shape index: {}]   ;;  %s4020_s1 = inlined_call_operand.hbm [shape: bf16[8,32], index: 1, kind: input, shape index: {}]   ;;  %s4021_s2 = inlined_call_operand.hbm [shape: f32[1,32], index: 2, kind: input, shape index: {}]   ;;  %s4022_s3 = inlined_call_operand.vmem [shape: bf16[2,32,32], index: 3, kind: input, shape index: {}]   ;;  %s4023_s4 = inlined_call_operand.vmem [shape: bf16[2,32,32], index: 4, kind: input, shape index: {}]   ;;  %s4024_s5 = inlined_call_operand.vmem [shape: bf16[2,32,32], index: 5, kind: input, shape index: {}]   ;;  %s4025_s6 = inlined_call_operand.vmem [shape: bf16[2,32,32], index: 6, kind: input, shape index: {}]   ;;  %s4026_s7 = inlined_call_operand.vmem [shape: f32[2,1,32], index: 7, kind: input, shape index: {}]   ;;  %s4027_s8 = inlined_call_operand.vmem [shape: f32[2,1,32], index: 8, kind: input, shape index: {}]   ;;  %s4028_s9 = inlined_call_operand.hbm [shape: bf16[2,32,64], index: 9, kind: input, shape index: {}]   ;;  %s4029_s10 = inlined_call_operand.vmem [shape: f32[2,1,64], index: 10, kind: input, shape index: {}]   ;;  %s4030_s11 = inlined_call_operand.vmem [shape: bf16[2,64,32], index: 11, kind: input, shape index: {}]   ;;  %s4031_s12 = inlined_call_operand.vmem [shape: f32[2,1,32], index: 12, kind: input, shape index: {}]   ;;  %s4032_s13 = inlined_call_operand.vmem [shape: f32[2,1,32], index: 13, kind: input, shape index: {}]   ;;  %s4033_s14 = inlined_call_operand.vmem [shape: f32[2,1,32], index: 14, kind: input, shape index: {}]   ;;  %s4034_s15 = inlined_call_operand.hbm [shape: f32[2,16,32], index: 15, kind: output, shape index: {0}]   ;;  %s4035_s16 = inlined_call_operand.hbm [shape: f32[2,32], index: 16, kind: output, shape index: {1}]  }
   0x1   :  { %4046 = sst [smem:[#allocation21_spill]] %s4019_s0 }
   0x2   :  { %4047 = sst [smem:[#allocation22_spill]] %s4020_s1 }
   0x3   :  { %4048 = sst [smem:[#allocation23_spill]] %s4021_s2 }
   0x4   :  { %4049 = sst [smem:[#allocation24_spill]] %s4022_s3 }
   0x5   :  { %4050 = sst [smem:[#allocation25_spill]] %s4023_s4 }
   0x6   :  { %4051 = sst [smem:[#allocation26_spill]] %s4024_s5 }
   0x7   :  { %4052 = sst [smem:[#allocation27_spill]] %s4025_s6 }
   0x8   :  { %4053 = sst [smem:[#allocation28_spill]] %s4028_s9 }
   0x9   :  { %4054 = sst [smem:[#allocation29_spill]] %s4032_s13 }
   0xa   :  { %4055 = sst [smem:[#allocation30_spill]] %s4033_s14 }
   0xb   :  { %4056 = sst [smem:[#allocation31_spill]] %s4034_s15 }
   0xc   :  { %4057 = sst [smem:[#allocation32_spill]] %s4035_s16 }
   0xd   :  { %22 = vsyncpa [#allocation5], 0 }
   0xe   :  { %23 = vsyncpa [#allocation8], 0 }
   0xf   :  { %24 = vsyncpa [#allocation6], 0 }
  0x10   :  { %25 = vsyncpa [#allocation12], 0  ;;  %s3446_s21 = smov 0   ;;  %s3448_s22 = smov 0  }
  0x11   :  { %s3450_s23 = smov 0   ;;  %s3452_s24 = smov 0  }
  0x12 LB: > { %4058 = sst [smem:[#allocation18_spill]] %s3339_s23  ;;  %s3465_s25 = sadd.s32 4294967295, %s3343_s24   ;;  %s3343_s24 = sphi %s3452_s24, %s4093_s24   ;;  %s3339_s23 = sphi %s3450_s23, %s4095_s23   ;;  %s3335_s22 = sphi %s3448_s22, %s4097_s22   ;;  %s3331_s21 = sphi %s3446_s21, %s4096_s21  }
  0x13   : > { %s3468_s26 = sadd.s32 1, %s3343_s24   ;;  %s257_s28 = sadd.s32 1, %s3339_s23 }
  0x14   : > { %4059 = sst [smem:[#allocation19_spill]] %s3468_s26  ;;  %s254_s27 = ssub.s32 %s3343_s24, %s3468_s26 }
  0x15   : > { %p255_p0 = scmp.eq.s32.totalorder %s254_s27, 0  ;;  %p264_p1 = scmp.ne.s32.totalorder %s3339_s23, %s3335_s22 }
  0x16   : > { %p265_p2 = scmp.eq.s32.totalorder %s3343_s24, 0  ;;  %p270_p3 = scmp.ne.s32.totalorder %s3335_s22, %s3331_s21 }
  0x17   : > { %s3478_s29 = scalar_select %p255_p0, %s3339_s23, %s257_s28  }
  0x18   : > { %p3480_p4 = por %p265_p2, %p264_p1  ;;  %p4041_p5 = scmp.eq.s32.totalorder %s3465_s25, 0 }
  0x19   : > { %4060 = sst [smem:[#allocation20_spill]] %s3478_s29  ;;  %p2682_p6 = scmp.ge.s32.totalorder %s3343_s24, 1 }
  0x1a   : > { %p453_p7 = scmp.lt.s32.totalorder %s3343_s24, 3  ;;  %p3489_p8 = por %p4041_p5, %p270_p3 }
  0x1b   : > { %s3345_s18 = smov [#allocation4]   ;;  %p3015_p12 = scmp.lt.s32.totalorder %s3343_s24, 2 }
  0x1c   : > { %s4062_s0 = scalar_select %p3489_p8, 1, 0 }
  0x1d   : > { %p3494_p10 = pnand %p2682_p6, %p453_p7  ;;  %s469_s19 = sshll.u32 %s3345_s18, 4  ;;  %s470_s19 = int_to_ptr.vmem [resolvable:$true] %s469_s19 }
  0x1e   : > { %s3346_s21 = smov [#allocation7]   ;;  %p3509_p0 = pnand %p3015_p12, %p3480_p4 }
  0x1f   : > { %s4063_s17 = scalar_select %p3494_p10, 1, 0 }
  0x20   : > { %p3002_p11 = pneg %p3494_p10  ;;  %s480_s27 = sshll.u32 %s3346_s21, 4  ;;  %s3513_s27 = int_to_ptr.vmem [resolvable:$true] %s480_s27 }
  0x21   : > { %s4065_s28 = scalar_select %p3509_p0, 1, 0 }
  0x22   : > { %p3503_p13 = pnand %p3002_p11, %p4041_p5  ;;  %s4066_s1 = sld [smem:[#allocation22_spill]] }
  0x24   : > { %p3157_p2 = pneg %p3503_p13 }
  0x28   : > { %s3155_s16 = scalar_lea.hbm %s4066_s1, 64 }
  0x29   : > { %p3156_p1 = scmp.ne.s32.totalorder %s4066_s1, %s3155_s16  ;;  %p3162_p6 = scmp.lt.u32.totalorder %s3155_s16, %s4066_s1 }
  0x2b   : > { %p3158_p3 = pnand %p3157_p2, %p3156_p1 }
  0x2d   : > { %p3159_p4 = pneg %p3158_p3 }
  0x2f   : > { %p3164_p7 = pnand %p3162_p6, %p3159_p4 }
  0x31   : > { %3167 = shalt.err (!%p3164_p7)
}
  0x32   : > { %s3168_s18 = scalar_lea.vmem %s470_s19, 64  ;;  %p3176_p5 = scmp.lt.s32.totalorder %s470_s19, %s470_s19 }
  0x33   : > { %p3169_p11 = scmp.ne.s32.totalorder %s470_s19, %s3168_s18  ;;  %p3177_p8 = scmp.lt.s32.totalorder %s3168_s18, %s3168_s18 }
  0x35   : > { %p3171_p12 = pnand %p3169_p11, %p3157_p2  ;;  %p3178_p10 = por %p3177_p8, %p3176_p5 }
  0x37   : > { %p3172_p9 = pneg %p3171_p12 }
  0x39   : > { %p3179_p0 = pnand %p3178_p10, %p3172_p9 }
  0x3b   : > { %3182 = shalt.err (!%p3179_p0)
}
  0x3c   : > { %3005 = dma.hbm_to_vmem [thread:$0]  (!%p3503_p13), %s4066_s1, 64, %s470_s19, [#allocation5]  }
  0x3d   : > { %s4067_s2 = sld [smem:[#allocation23_spill]] }
  0x43   : > { %s3183_s29 = scalar_lea.hbm %s4067_s2, 16 }
  0x44   : > { %p3184_p1 = scmp.ne.s32.totalorder %s4067_s2, %s3183_s29  ;;  %p3190_p9 = scmp.lt.u32.totalorder %s3183_s29, %s4067_s2 }
  0x46   : > { %p3186_p5 = pnand %p3184_p1, %p3157_p2 }
  0x48   : > { %p3187_p8 = pneg %p3186_p5 }
  0x4a   : > { %p3192_p10 = pnand %p3190_p9, %p3187_p8 }
  0x4c   : > { %3195 = shalt.err (!%p3192_p10)
}
  0x4d   : > { %s3196_s19 = scalar_lea.vmem %s3513_s27, 16  ;;  %s3203_s14 = scalar_lea.vmem %s3513_s27, 32 }
  0x4e   : > { %p3197_p0 = scmp.ne.s32.totalorder %s3513_s27, %s3196_s19  ;;  %p3204_p6 = scmp.lt.s32.totalorder %s3513_s27, %s3513_s27 }
  0x4f   : > { %p3205_p7 = scmp.lt.s32.totalorder %s3203_s14, %s3196_s19 }
  0x50   : > { %p3199_p3 = pnand %p3197_p0, %p3157_p2 }
  0x51   : > { %p3206_p11 = por %p3205_p7, %p3204_p6 }
  0x52   : > { %p3200_p4 = pneg %p3199_p3 }
  0x54   : > { %p3207_p12 = pnand %p3206_p11, %p3200_p4 }
  0x56   : > { %3210 = shalt.err (!%p3207_p12)
}
  0x57   : > { %3008 = dma.hbm_to_vmem [thread:$0]  (!%p3503_p13), %s4067_s2, 16, %s3513_s27, [#allocation8]  }
  0x58   : > { %s537_s16 = sand.u32 1, %s3339_s23   ;;  %s2762_s26 = sshll.u32 %s3343_s24, 8 }
  0x59   : > { %s2686_s29 = sshll.u32 %s537_s16, 4  ;;  %s4068_s9 = sld [smem:[#allocation28_spill]] }
  0x5a   : > { %s539_s20 = scalar_lea.vmem [#allocation9], %s2686_s29  ;;  %s4069_s14 = sand.u32 1, %s3343_s24  }
  0x5b   : > { %s546_s19 = sshll.u32 %s539_s20, 4  ;;  %s3575_s13 = scalar_lea.sflag [#allocation5], %s4069_s14  ;;  %s3571_s19 = int_to_ptr.vmem [resolvable:$true] %s546_s19 }
  0x5c   : > { %p4070_p2 = scmp.ne.s32.totalorder %s4065_s28, 0 }
  0x5e   : > { %p3213_p1 = pneg %p4070_p2 }
  0x5f   : > { %s3569_s18 = scalar_lea.hbm %s4068_s9, %s2762_s26  ;;  %s3216_s26 = scalar_lea.hbm %s4068_s9, 512 }
  0x60   : > { %s3211_s27 = scalar_lea.hbm %s3569_s18, 256  ;;  %p3217_p9 = scmp.lt.u32.totalorder %s3569_s18, %s4068_s9 }
  0x61   : > { %p3212_p13 = scmp.ne.s32.totalorder %s3569_s18, %s3211_s27  ;;  %p3218_p10 = scmp.lt.u32.totalorder %s3216_s26, %s3211_s27 }
  0x62   : > { %p3220_p3 = scmp.lt.u32.totalorder %s3211_s27, %s3569_s18 }
  0x63   : > { %p3214_p5 = pnand %p3213_p1, %p3212_p13  ;;  %p3219_p0 = por %p3218_p10, %p3217_p9 }
  0x65   : > { %p3215_p8 = pneg %p3214_p5  ;;  %p3221_p4 = por %p3220_p3, %p3219_p0 }
  0x67   : > { %p3222_p6 = pnand %p3221_p4, %p3215_p8 }
  0x69   : > { %3225 = shalt.err (!%p3222_p6)
}
  0x6a   : > { %s3226_s24 = scalar_lea.vmem %s3571_s19, 256  ;;  %s3347_s21 = smov [#allocation9]  }
  0x6b   : > { %p3227_p7 = scmp.ne.s32.totalorder %s3571_s19, %s3226_s24  ;;  %s3231_s20 = sshll.u32 %s3347_s21, 4  ;;  %s3232_s20 = int_to_ptr.vmem [resolvable:$false] %s3231_s20 }
  0x6c   : > { %s3233_s14 = scalar_lea.vmem %s3232_s20, 512  ;;  %p3234_p13 = scmp.lt.s32.totalorder %s3571_s19, %s3232_s20 }
  0x6d   : > { %p3229_p11 = pnand %p3227_p7, %p3213_p1  ;;  %p3235_p5 = scmp.lt.s32.totalorder %s3233_s14, %s3226_s24 }
  0x6f   : > { %p3230_p12 = pneg %p3229_p11  ;;  %p3236_p9 = por %p3235_p5, %p3234_p13 }
  0x71   : > { %p3237_p10 = pnand %p3236_p9, %p3230_p12 }
  0x73   : > { %3240 = shalt.err (!%p3237_p10)
}
  0x74   : > { %s3348_s27 = smov 64   ;;  %s3349_s15 = smov 4  }
  0x75   : > { %3012 = dma.hbm_to_vmem [thread:$0]  (!%p4070_p2), %s3569_s18, 256, %s3571_s19, %s3575_s13, %s3348_s27, %s3348_s27, %s3349_s15  }
  0x76   : > { %p4071_p1 = scmp.ne.s32.totalorder %s4063_s17, 0 }
  0x77   : > { %p4072_p8 = scmp.eq.s32.totalorder (!%p4071_p1), %s3465_s25, 0 }
  0x78   : > { %590 = sbr.rel (%p4071_p1) target bundleno = 4002 (0xfa2), region = 80 }
  0x7f   : > { %3310 = dma.done.wait (%p4072_p8), [#allocation5], 64   ;;  %p4073_p0 = pmov %p4072_p8 }
  0x81   : > { %3312 = vsyncadd (%p4073_p0), [#allocation5], 4294967232  ;;  %p4074_p3 = pmov %p4073_p0 }
  0x82   : > { %p4075_p4 = pmov %p4073_p0 }
  0x83   : > { %3314 = dma.done.wait (%p4074_p3), [#allocation8], 16  }
  0x84   : > { %3316 = vsyncadd (%p4075_p4), [#allocation8], 4294967280  ;;  %s600_s28 = sand.u32 1, %s3465_s25   ;;  %s602_s18 = sand.u32 1, %s3335_s22  }
  0x85   : > { %s3615_s19 = sshll.u32 %s602_s18, 4  ;;  %s601_s17 = scalar_lea.sflag [#allocation5], %s600_s28 }
  0x86   : > { %p4076_p2 = scmp.ne.s32.totalorder %s4062_s0, 0 }
  0x88   : > { %3318 = dma.done.wait (%p4076_p2), %s601_s17, 256  }
  0x89   : > { %3320 = vsyncadd (%p4076_p2), %s601_s17, 4294967040  ;;  %p691_p6 = scmp.lt.s32.totalorder %s3465_s25, 1  ;;  %s4077_s3 = sld [smem:[#allocation24_spill]] }
  0x8a   : > { %s4078_s4 = sld [smem:[#allocation25_spill]]  ;;  %s4079_s5 = sld [smem:[#allocation26_spill]] }
  0x8b   : > { %s3624_s16 = scalar_select %p691_p6, %s3465_s25, 1 }
  0x8c   : > { %s4080_s6 = sld [smem:[#allocation27_spill]]  ;;  %s4082_s0 = sld [smem:[#allocation30_spill]] }
  0x8d   : > { %s2763_s26 = sshll.u32 %s3624_s16, 4  ;;  %s719_s14 = scalar_lea.vmem %s4029_s10, %s3624_s16 }
  0x8e   : > { %s2767_s27 = sshll.u32 %s3624_s16, 5  ;;  %s727_s28 = scalar_lea.vmem %s4031_s12, %s3624_s16 }
  0x8f   : > { %s3634_s20 = scalar_lea.vmem %s4077_s3, %s2763_s26  ;;  %s3667_s9 = scalar_lea.vmem %s4030_s11, %s2767_s27 }
  0x90   : > { %s3639_s15 = scalar_lea.vmem %s4078_s4, %s2763_s26  ;;  %s3644_s17 = scalar_lea.vmem %s4079_s5, %s2763_s26 }
  0x91   : > { %p4083_p7 = scmp.ne.s32.totalorder %s3465_s25, 0 }
  0x92   : > { %s3649_s30 = scalar_lea.vmem %s4080_s6, %s2763_s26  ;;  %s4081_s26 = sld [smem:[#allocation29_spill]]  ;;  %v745_v0 = vld [vmem:[#allocation4] sm:$0xf] (!%p4083_p7)  ;;  %vm760_vm0 = vcmask (!%p4083_p7), 1043456   ;;  %vm753_vm1 = vcmask (!%p4083_p7), 64512   ;;  %vm813_vm2 = vcmask (!%p4083_p7), 261120  }
  0x93   : > { %s733_s23 = scalar_lea.vmem %s4082_s0, %s3624_s16  ;;  %738 = sbr.rel (%p4083_p7) target bundleno = 376 (0x178), region = 96  ;;  %2983 = vmatprep.subr.msk.bf16.mxu0 (!%p4083_p7), %vm760_vm0, %v745_v0  ;;  %v762_v3 = vsel (!%p4083_p7), %vm760_vm0, %v745_v0, 0  ;;  %v2704_v8 = vld [vmem:[#allocation7] ss:$0 sm:$0xff] (!%p4083_p7) }
  0x94   : > { %s4084_s4 = sld [smem:[#allocation21_spill]] (!%p4083_p7)  ;;  %2830 = vmatpush3.bf16.msra.mxu0 (!%p4083_p7), %v762_v3 }
  0x98   : > { %s730_s6 = scalar_lea.vmem %s4081_s26, %s3624_s16 }
  0x9a   : > { %v739_v1 = vld [vmem:[%s4084_s4] sm:$0xff]  ;;  %v740_v2 = vld [vmem:[%s4084_s4 + $0x8] sm:$0xff]  ;;  %v741_v5 = vld [vmem:[%s4084_s4 + $0x10] sm:$0xff] }
  0x9b   : > { %v743_v4 = vpack.c.bf16 %v740_v2, %v739_v1  ;;  %v742_v6 = vld [vmem:[%s4084_s4 + $0x18] sm:$0xff] }
  0x9c   : > { %v744_v7 = vpack.c.bf16 %v742_v6, %v741_v5 }
  0x9d   : > { %2831 = vmatprep.mubr.msk.bf16.mxu0 %vm753_vm1, %v743_v4 }
  0x9e   : > { %2832 = vmatmul.mubr.msk.bf16.vlgmr.msra.gmra.mrb[0].mxu0 %vm753_vm1, %v744_v7 }
 0x171   : > { %v2833_v9 = vpop.f32.mrb[0].mxu0 }
 0x172   : > { %v807_v10 = vadd.f32 %v2833_v9, %v2704_v8  ;;  %v798_v11 = vpop.f32.mrb[1].mxu0 }
 0x173   : > { %v799_v12 = vadd.f32 %v2704_v8, %v798_v11  ;;  %v2834_v13 = vpop.f32.mrb[2].mxu0 }
 0x174   : > { %816 = vst.msk [vmem:[#allocation2 + $0x10] sm:$0xff] %vm813_vm2, %v807_v10  ;;  %v810_v14 = vadd.f32 %v2834_v13, %v2704_v8  ;;  %v801_v15 = vpop.f32.mrb[3].mxu0 }
 0x175   : > { %814 = vst.msk [vmem:[#allocation2] sm:$0xff] %vm813_vm2, %v799_v12  ;;  %v802_v16 = vadd.f32 %v2704_v8, %v801_v15 }
 0x176   : > { %817 = vst.msk [vmem:[#allocation2 + $0x18] sm:$0xff] %vm813_vm2, %v810_v14 }
 0x177   : > { %815 = vst.msk [vmem:[#allocation2 + $0x8] sm:$0xff] %vm813_vm2, %v802_v16 }
 0x178 PF: > { %v3069_v17 = vld [vmem:[%s3639_s15] sm:$0xff]   ;;  %v3070_v18 = vld [vmem:[%s3639_s15 + $0x8] sm:$0xff]   ;;  %vm840_vm3 = vcmask 261120   ;;  %v3350_v29 = vmov 0.0   ;;  %vm3351_vm4 = vmmov 0   ;;  %vm1032_vm5 = vcmask 64512   ;;  %s4087_s3 = scalar_lea.vmem %s4026_s7, %s3624_s16  ;;  %s4088_s27 = scalar_lea.vmem %s4027_s8, %s3624_s16 }
 0x179   : > { %2843 = vmatprep.subr.bf16.mxu1 %v3069_v17  ;;  %v3071_v19 = vld [vmem:[%s3634_s20] sm:$0xff]   ;;  %v3072_v25 = vld [vmem:[%s3634_s20 + $0x8] sm:$0xff]   ;;  %vm1127_vm6 = vcmask 130048   ;;  %s3352_s20 = smov 120   ;;  %s3353_s15 = smov 112   ;;  %vm1524_vm7 = vcmask 130112  }
 0x17a   : > { %2844 = vmatpush3.bf16.msra.mxu1 %v3069_v17  ;;  %2835 = vmatprep.subr.bf16.mxu0 %v3071_v19  ;;  %v3073_v27 = vld [vmem:[%s3644_s17] sm:$0xff]   ;;  %v3074_v28 = vld [vmem:[%s3644_s17 + $0x8] sm:$0xff]   ;;  %s3354_s17 = smov 104   ;;  %s3355_s13 = smov 8   ;;  %vm1779_vm8 = vcmask 195712   ;;  %vm2034_vm9 = vcmask 261312  }
 0x17b   : > { %v820_v22 = vld [vmem:[#allocation2 + $0x10] sm:$0xff]  ;;  %2845 = vmatprep.subr.bf16.mxu1 %v3070_v18  ;;  %2836 = vmatpush3.bf16.msra.mxu0 %v3071_v19  ;;  %s3356_s26 = smov 16   ;;  %s3357_s24 = smov 24   ;;  %vm2303_vm10 = vcmask 523264  }
 0x17c   : > { %v818_v20 = vld [vmem:[#allocation2] sm:$0xff]  ;;  %2837 = vmatprep.subr.bf16.mxu0 %v3072_v25  ;;  %p2755_p11 = scmp.ne.s32.totalorder %s3465_s25, 1 }
 0x17d   : > { %v821_v24 = vld [vmem:[#allocation2 + $0x18] sm:$0xff]  ;;  %vm2462_vm11 = vcmask (!%p2755_p11), 1041409   ;;  %vm2465_vm12 = vcmask (!%p2755_p11), 254976  }
 0x17e   : > { %v819_v21 = vld [vmem:[#allocation2 + $0x8] sm:$0xff]  ;;  %v823_v26 = vpack.c.bf16 %v821_v24, %v820_v22  ;;  %2846 = vmatpush3.bf16.msra.mxu1 %v3070_v18 }
 0x17f   : > { %v822_v23 = vpack.c.bf16 %v819_v21, %v818_v20  ;;  %2838 = vmatpush3.bf16.msra.mxu0 %v3072_v25  ;;  %2859 = vmatprep.subr.bf16.mxu1 %v3350_v29 }
 0x180   : > { %2851 = vmatprep.subr.bf16.mxu0 %v3073_v27 }
 0x181   : > { %2847 = vmatprep.mubr.msk.bf16.mxu1 %vm840_vm3, %v822_v23  ;;  %2839 = vmatprep.mubr.msk.bf16.mxu0 %vm840_vm3, %v822_v23 }
 0x182   : > { %2848 = vmatmul.mubr.msk.bf16.vlgmr.msra.gmra.mrb[0].mxu1 %vm840_vm3, %v823_v26  ;;  %2840 = vmatmul.mubr.msk.bf16.vlgmr.msra.gmra.mrb[0].mxu0 %vm840_vm3, %v823_v26 }
 0x183   : > { %2852 = vmatpush3.bf16.msra.mxu0 %v3073_v27  ;;  %2855 = vmatprep.mubr.msk.bf16.mxu0 %vm840_vm3, %v822_v23 }
 0x184   : > { %2853 = vmatprep.subr.bf16.mxu0 %v3074_v28  ;;  %2861 = vmatprep.mubr.msk.bf16.mxu1 %vm3351_vm4, %v3350_v29 }
 0x187   : > { %2854 = vmatpush3.bf16.msra.mxu0 %v3074_v28 }
 0x188   : > { %2865 = vmatprep.subr.bf16.mxu0 %v3350_v29 }
 0x18a   : > { %2856 = vmatmul.mubr.msk.bf16.vlgmr.msra.gmra.mrb[4].mxu0 %vm840_vm3, %v823_v26 }
 0x18b   : > { %2867 = vmatprep.mubr.msk.bf16.mxu0 %vm3351_vm4, %v3350_v29 }
 0x255   : > { %v2849_v30 = vpop.f32.mrb[0].mxu1  ;;  %v2841_v33 = vpop.f32.mrb[0].mxu0 }
 0x256   : > { %v948_v31 = vpop.f32.mrb[1].mxu1  ;;  %v881_v36 = vpop.f32.mrb[1].mxu0 }
 0x257   : > { %v2850_v32 = vpop.f32.mrb[2].mxu1  ;;  %v2842_v38 = vpop.f32.mrb[2].mxu0 }
 0x258   : > { %v3709_v34 = vpack.c.bf16 %v2850_v32, %v2849_v30  ;;  %v951_v35 = vpop.f32.mrb[3].mxu1  ;;  %v3715_v40 = vpack.c.bf16 %v2842_v38, %v2841_v33  ;;  %v884_v41 = vpop.f32.mrb[3].mxu0 }
 0x259   : > { %v3711_v37 = vpack.c.bf16 %v951_v35, %v948_v31  ;;  %v3719_v43 = vpack.c.bf16 %v884_v41, %v881_v36 }
 0x25a   : > { %v1084_v39 = vsel %vm1032_vm5, %v3709_v34, 0 }
 0x25b   : > { %2866 = vmatpush3.bf16.xpose.msra.mxu0 %v1084_v39  ;;  %v1037_v42 = vsel %vm1032_vm5, %v3711_v37, 0 }
 0x25c   : > { %2860 = vmatpush3.bf16.xpose.msra.mxu1 %v1037_v42  ;;  %2877 = vmatprep.subr.bf16.mxu0 %v3350_v29 }
 0x25d   : > { %2871 = vmatprep.subr.bf16.mxu1 %v3350_v29  ;;  %v2857_v44 = vpop.f32.mrb[4].mxu0 }
 0x25e   : > { %v1015_v45 = vpop.f32.mrb[5].mxu0 }
 0x25f   : > { %v2858_v46 = vpop.f32.mrb[6].mxu0 }
 0x260   : > { %v3725_v47 = vpack.c.bf16 %v2858_v46, %v2857_v44  ;;  %v1018_v48 = vpop.f32.mrb[7].mxu0 }
 0x261   : > { %v3729_v49 = vpack.c.bf16 %v1018_v48, %v1015_v45 }
 0x262   : > { %2868 = vmatmul.mubr.msk.bf16.vlgmr.msra.gmra.mrb[8].mxu0 %vm1032_vm5, %v3715_v40 }
 0x263   : > { %2862 = vmatmul.mubr.msk.bf16.vlgmr.msra.gmra.mrb[4].mxu1 %vm1032_vm5, %v3719_v43  ;;  %2879 = vmatprep.mubr.msk.bf16.mxu0 %vm3351_vm4, %v3350_v29 }
 0x264   : > { %2878 = vmatpush3.bf16.msra.mxu0 %v3725_v47  ;;  %2873 = vmatprep.mubr.msk.bf16.mxu1 %vm3351_vm4, %v3350_v29 }
 0x265   : > { %2872 = vmatpush3.bf16.msra.mxu1 %v3729_v49  ;;  %2889 = vmatprep.subr.bf16.mxu0 %v3350_v29 }
 0x266   : > { %2883 = vmatprep.subr.bf16.mxu1 %v3350_v29 }
 0x335   : > { %v1120_v50 = vpop.f32.mrb[8].mxu0 }
 0x336   : > { %v1073_v51 = vpop.f32.mrb[4].mxu1  ;;  %v2869_v52 = vpop.f32.mrb[9].mxu0  ;;  %v1134_v53 = vsel %vm1127_vm6, %v1120_v50, -inf }
 0x337   : > { %1135 = vmax.xlane.f32.xlu1 %v1134_v53  ;;  %v2863_v54 = vpop.f32.mrb[5].mxu1  ;;  %v1123_v55 = vpop.f32.mrb[10].mxu0  ;;  %v1128_v56 = vsel %vm1127_vm6, %v1073_v51, -inf }
 0x338   : > { %v2870_v57 = vpop.f32.mrb[11].mxu0  ;;  %1129 = vmax.xlane.f32.xlu0 %v1128_v56  ;;  %v1076_v58 = vpop.f32.mrb[6].mxu1  ;;  %v1137_v60 = vsel %vm1127_vm6, %v1123_v55, -inf }
 0x339   : > { %v2864_v59 = vpop.f32.mrb[7].mxu1  ;;  %v1131_v61 = vsel %vm1127_vm6, %v1076_v58, -inf }
 0x33b   : > { %1138 = vmax.xlane.f32.xlu1 %v1137_v60 }
 0x33c   : > { %1132 = vmax.xlane.f32.xlu0 %v1131_v61 }
 0x34c   : > { %1323 = vrot.lane.b32.xlu1 %v3709_v34, %s3352_s20 }
 0x3c4   : > { %v1136_v62 = vpop.xlane.xlu1 %1135 }
 0x3c5   : > { %v1142_v63 = vsub.f32 %v1120_v50, %v1136_v62  ;;  %v1130_v0 = vpop.xlane.xlu0 %1129 }
 0x3c6   : > { %v1140_v1 = vsub.f32 %v1073_v51, %v1130_v0 }
 0x3c7   : > { %v1148_v2 = vmul.f32 1.442695, %v1142_v63 }
 0x3c8   : > { %v1144_v3 = vmul.f32 1.442695, %v1140_v1  ;;  %v1139_v4 = vpop.xlane.xlu1 %1138 }
 0x3c9   : > { %3083 = vpow2.f32 %v1148_v2  ;;  %v1143_v5 = vsub.f32 %v1123_v55, %v1139_v4  ;;  %v1133_v6 = vpop.xlane.xlu0 %1132 }
 0x3ca   : > { %v1141_v7 = vsub.f32 %v1076_v58, %v1133_v6  ;;  %3085 = vpow2.f32 %v1144_v3 }
 0x3cb   : > { %v1150_v8 = vmul.f32 1.442695, %v1143_v5 }
 0x3cc   : > { %v1146_v9 = vmul.f32 1.442695, %v1141_v7  ;;  %v1324_v18 = vpop.permute.xlu1 %1323 }
 0x3cd   : > { %3087 = vpow2.f32 %v1150_v8  ;;  %v1329_v31 = vsel %vm1032_vm5, %v1324_v18, 0 }
 0x3ce   : > { %3089 = vpow2.f32 %v1146_v9 }
 0x3d3   : > { %v3084_v10 = vpop.eup %3083 }
 0x3d4   : > { %v1158_v11 = vsel %vm1127_vm6, %v3084_v10, 0.0  ;;  %v3086_v12 = vpop.eup %3085 }
 0x3d5   : > { %1159 = vadd.xlane.f32.xlu0 %v1158_v11  ;;  %v1152_v15 = vsel %vm1127_vm6, %v3086_v12, 0.0 }
 0x3d7   : > { %v3088_v13 = vpop.eup %3087 }
 0x3d8   : > { %v1161_v14 = vsel %vm1127_vm6, %v3088_v13, 0.0  ;;  %v3090_v16 = vpop.eup %3089 }
 0x3d9   : > { %1162 = vadd.xlane.f32.xlu1 %v1161_v14  ;;  %1153 = vadd.xlane.f32.xlu0 %v1152_v15  ;;  %v1155_v17 = vsel %vm1127_vm6, %v3090_v16, 0.0 }
 0x3dd   : > { %1156 = vadd.xlane.f32.xlu1 %v1155_v17 }
 0x3ee   : > { %1267 = vrot.lane.b32.xlu1 %v3719_v43, %s3352_s20 }
 0x3ef   : > { %1270 = vrot.lane.b32.xlu0 %v3711_v37, %s3352_s20 }
 0x3f2   : > { %1320 = vrot.lane.b32.xlu1 %v3715_v40, %s3352_s20 }
 0x462   : > { %v1160_v19 = vpop.xlane.xlu0 %1159 }
 0x463   : > { %3091 = vrcp.f32 %v1160_v19 }
 0x466   : > { %v1163_v20 = vpop.xlane.xlu1 %1162  ;;  %v1154_v21 = vpop.xlane.xlu0 %1153 }
 0x467   : > { %3093 = vrcp.f32 %v1163_v20 }
 0x468   : > { %3095 = vrcp.f32 %v1154_v21 }
 0x46a   : > { %v1157_v22 = vpop.xlane.xlu1 %1156  ;;  %v1271_v35 = vpop.permute.xlu0 %1270 }
 0x46b   : > { %3097 = vrcp.f32 %v1157_v22  ;;  %v1276_v39 = vsel %vm1032_vm5, %v1271_v35, 0 }
 0x46d   : > { %v3092_v23 = vpop.eup %3091 }
 0x46e   : > { %v1170_v25 = vmul.f32 %v3092_v23, %v3084_v10  ;;  %v1268_v36 = vpop.permute.xlu1 %1267 }
 0x471   : > { %v3094_v24 = vpop.eup %3093 }
 0x472   : > { %v1171_v26 = vmul.f32 %v3094_v24, %v3088_v13  ;;  %v3096_v27 = vpop.eup %3095  ;;  %v1321_v41 = vpop.permute.xlu1 %1320 }
 0x473   : > { %v1168_v32 = vmul.f32 %v3096_v27, %v3086_v12 }
 0x474   : > { %v1173_v28 = vpack.c.bf16 %v1171_v26, %v1170_v25 }
 0x475   : > { %v3098_v30 = vpop.eup %3097 }
 0x476   : > { %v1169_v33 = vmul.f32 %v3098_v30, %v3090_v16  ;;  %2880 = vmatmul.mubr.msk.bf16.vlgmr.msra.gmra.mrb[12].mxu0 %vm1127_vm6, %v1173_v28 }
 0x477   : > { %2890 = vmatpush3.bf16.xpose.msra.mxu0 %v1329_v31  ;;  %2891 = vmatprep.mubr.msk.bf16.mxu0 %vm3351_vm4, %v3350_v29 }
 0x478   : > { %v1172_v38 = vpack.c.bf16 %v1169_v33, %v1168_v32  ;;  %2901 = vmatprep.subr.bf16.mxu0 %v3350_v29 }
 0x47a   : > { %2874 = vmatmul.mubr.msk.bf16.vlgmr.msra.gmra.mrb[8].mxu1 %vm1127_vm6, %v1172_v38 }
 0x47b   : > { %2884 = vmatpush3.bf16.xpose.msra.mxu1 %v1276_v39  ;;  %2885 = vmatprep.mubr.msk.bf16.mxu1 %vm3351_vm4, %v3350_v29 }
 0x47c   : > { %2895 = vmatprep.subr.bf16.mxu1 %v3350_v29 }
 0x47e   : > { %2892 = vmatmul.mubr.msk.bf16.vlgmr.msra.gmra.mrb[16].mxu0 %vm1032_vm5, %v1321_v41 }
 0x47f   : > { %2903 = vmatprep.mubr.msk.bf16.mxu0 %vm3351_vm4, %v3350_v29 }
 0x482   : > { %2886 = vmatmul.mubr.msk.bf16.vlgmr.msra.gmra.mrb[12].mxu1 %vm1032_vm5, %v1268_v36 }
 0x483   : > { %2897 = vmatprep.mubr.msk.bf16.mxu1 %vm3351_vm4, %v3350_v29 }
 0x549   : > { %v1255_v42 = vpop.f32.mrb[12].mxu0 }
 0x54a   : > { %v2881_v44 = vpop.f32.mrb[13].mxu0 }
 0x54b   : > { %v1258_v45 = vpop.f32.mrb[14].mxu0 }
 0x54c   : > { %v1263_v46 = vpack.c.bf16 %v1258_v45, %v1255_v42  ;;  %v2882_v48 = vpop.f32.mrb[15].mxu0 }
 0x54d   : > { %v1211_v50 = vpop.f32.mrb[8].mxu1 }
 0x54e   : > { %1265 = vst.msk [vmem:[#allocation3 + $0x8] sm:$0xff] %vm1032_vm5, %v1263_v46  ;;  %v2875_v51 = vpop.f32.mrb[9].mxu1 }
 0x54f   : > { %v1214_v52 = vpop.f32.mrb[10].mxu1 }
 0x550   : > { %v1262_v53 = vpack.c.bf16 %v1214_v52, %v1211_v50  ;;  %v2876_v54 = vpop.f32.mrb[11].mxu1 }
 0x551   : > { %v1365_v55 = vpop.f32.mrb[16].mxu0 }
 0x552   : > { %1264 = vst.msk [vmem:[#allocation3] sm:$0xff] %vm1032_vm5, %v1262_v53  ;;  %v2893_v56 = vpop.f32.mrb[17].mxu0  ;;  %v1378_v1 = vsel %vm1127_vm6, %v1365_v55, -inf }
 0x553   : > { %v1368_v57 = vpop.f32.mrb[18].mxu0 }
 0x554   : > { %v2894_v58 = vpop.f32.mrb[19].mxu0  ;;  %v1381_v2 = vsel %vm1127_vm6, %v1368_v57, -inf }
 0x555   : > { %v1312_v59 = vpop.f32.mrb[12].mxu1 }
 0x556   : > { %v2887_v60 = vpop.f32.mrb[13].mxu1  ;;  %v1372_v61 = vsel %vm1127_vm6, %v1312_v59, -inf }
 0x557   : > { %1373 = vmax.xlane.f32.xlu0 %v1372_v61  ;;  %v1315_v62 = vpop.f32.mrb[14].mxu1 }
 0x558   : > { %v2888_v63 = vpop.f32.mrb[15].mxu1  ;;  %v1375_v0 = vsel %vm1127_vm6, %v1315_v62, -inf }
 0x559   : > { %1376 = vmax.xlane.f32.xlu1 %v1375_v0 }
 0x55b   : > { %1379 = vmax.xlane.f32.xlu0 %v1378_v1 }
 0x55f   : > { %1382 = vmax.xlane.f32.xlu0 %v1381_v2 }
 0x56a   : > { %1467 = vrot.lane.b32.xlu1 %v3725_v47, %s3352_s20 }
 0x56e   : > { %1529 = vrot.lane.b32.xlu1 %v3711_v37, %s3353_s15 }
 0x5e4   : > { %v1374_v3 = vpop.xlane.xlu0 %1373 }
 0x5e5   : > { %v1384_v5 = vsub.f32 %v1312_v59, %v1374_v3 }
 0x5e6   : > { %v1377_v4 = vpop.xlane.xlu1 %1376 }
 0x5e7   : > { %v1388_v9 = vmul.f32 1.442695, %v1384_v5  ;;  %v1385_v10 = vsub.f32 %v1315_v62, %v1377_v4 }
 0x5e8   : > { %v1380_v6 = vpop.xlane.xlu0 %1379 }
 0x5e9   : > { %v1386_v7 = vsub.f32 %v1365_v55, %v1380_v6  ;;  %v1390_v14 = vmul.f32 1.442695, %v1385_v10 }
 0x5ea   : > { %v1468_v8 = vpop.permute.xlu1 %1467 }
 0x5eb   : > { %v1392_v11 = vmul.f32 1.442695, %v1386_v7  ;;  %2902 = vmatpush3.bf16.msra.mxu0 %v1468_v8 }
 0x5ec   : > { %v1383_v12 = vpop.xlane.xlu0 %1382  ;;  %2913 = vmatprep.subr.bf16.mxu0 %v3350_v29 }
 0x5ed   : > { %3099 = vpow2.f32 %v1392_v11  ;;  %v1387_v13 = vsub.f32 %v1368_v57, %v1383_v12 }
 0x5ee   : > { %3101 = vpow2.f32 %v1388_v9  ;;  %v1530_v24 = vpop.permute.xlu1 %1529 }
 0x5ef   : > { %v1394_v15 = vmul.f32 1.442695, %v1387_v13  ;;  %v1535_v48 = vsel %vm1032_vm5, %v1530_v24, 0 }
 0x5f1   : > { %3103 = vpow2.f32 %v1394_v15 }
 0x5f2   : > { %3105 = vpow2.f32 %v1390_v14 }
 0x5f7   : > { %v3100_v16 = vpop.eup %3099 }
 0x5f8   : > { %v1402_v17 = vsel %vm1127_vm6, %v3100_v16, 0.0  ;;  %v3102_v18 = vpop.eup %3101 }
 0x5f9   : > { %1403 = vadd.xlane.f32.xlu0 %v1402_v17  ;;  %v1396_v20 = vsel %vm1127_vm6, %v3102_v18, 0.0 }
 0x5fb   : > { %v3104_v19 = vpop.eup %3103 }
 0x5fc   : > { %v1405_v21 = vsel %vm1127_vm6, %v3104_v19, 0.0  ;;  %v3106_v22 = vpop.eup %3105 }
 0x5fd   : > { %1397 = vadd.xlane.f32.xlu0 %v1396_v20  ;;  %1406 = vadd.xlane.f32.xlu1 %v1405_v21  ;;  %v1399_v23 = vsel %vm1127_vm6, %v3106_v22, 0.0 }
 0x601   : > { %1400 = vadd.xlane.f32.xlu1 %v1399_v23 }
 0x612   : > { %1580 = vrot.lane.b32.xlu1 %v3709_v34, %s3353_s15 }
 0x613   : > { %1419 = vrot.lane.b32.xlu0 %v3729_v49, %s3352_s20 }
 0x616   : > { %1578 = vrot.lane.b32.xlu1 %v3715_v40, %s3353_s15 }
 0x617   : > { %1527 = vrot.lane.b32.xlu0 %v3719_v43, %s3353_s15 }
 0x686   : > { %v1404_v25 = vpop.xlane.xlu0 %1403 }
 0x687   : > { %3107 = vrcp.f32 %v1404_v25 }
 0x68a   : > { %v1398_v26 = vpop.xlane.xlu0 %1397  ;;  %v1407_v27 = vpop.xlane.xlu1 %1406 }
 0x68b   : > { %3109 = vrcp.f32 %v1407_v27 }
 0x68c   : > { %3111 = vrcp.f32 %v1398_v26 }
 0x68e   : > { %v1420_v28 = vpop.permute.xlu0 %1419  ;;  %v1401_v30 = vpop.xlane.xlu1 %1400 }
 0x68f   : > { %3113 = vrcp.f32 %v1401_v30  ;;  %2896 = vmatpush3.bf16.msra.mxu1 %v1420_v28 }
 0x690   : > { %2907 = vmatprep.subr.bf16.mxu1 %v3350_v29 }
 0x691   : > { %v3108_v31 = vpop.eup %3107 }
 0x692   : > { %v1414_v35 = vmul.f32 %v3108_v31, %v3100_v16  ;;  %v1581_v38 = vpop.permute.xlu1 %1580  ;;  %v1528_v51 = vpop.permute.xlu0 %1527 }
 0x693   : > { %v1586_v45 = vsel %vm1032_vm5, %v1581_v38, 0 }
 0x695   : > { %v3110_v32 = vpop.eup %3109 }
 0x696   : > { %v3112_v33 = vpop.eup %3111  ;;  %v1415_v36 = vmul.f32 %v3110_v32, %v3104_v19  ;;  %v1579_v50 = vpop.permute.xlu1 %1578 }
 0x697   : > { %v1412_v42 = vmul.f32 %v3112_v33, %v3102_v18 }
 0x698   : > { %v1417_v41 = vpack.c.bf16 %v1415_v36, %v1414_v35 }
 0x699   : > { %v3114_v39 = vpop.eup %3113 }
 0x69a   : > { %v1413_v44 = vmul.f32 %v3114_v39, %v3106_v22  ;;  %2904 = vmatmul.mubr.msk.bf16.vlgmr.msra.gmra.mrb[20].mxu0 %vm1127_vm6, %v1417_v41 }
 0x69b   : > { %2914 = vmatpush3.bf16.xpose.msra.mxu0 %v1586_v45  ;;  %2915 = vmatprep.mubr.msk.bf16.mxu0 %vm3351_vm4, %v3350_v29 }
 0x69c   : > { %v1416_v46 = vpack.c.bf16 %v1413_v44, %v1412_v42  ;;  %2925 = vmatprep.subr.bf16.mxu0 %v3350_v29 }
 0x69e   : > { %2898 = vmatmul.mubr.msk.bf16.vlgmr.msra.gmra.mrb[16].mxu1 %vm1127_vm6, %v1416_v46 }
 0x69f   : > { %2908 = vmatpush3.bf16.xpose.msra.mxu1 %v1535_v48  ;;  %2909 = vmatprep.mubr.msk.bf16.mxu1 %vm3351_vm4, %v3350_v29 }
 0x6a0   : > { %2919 = vmatprep.subr.bf16.mxu1 %v3350_v29 }
 0x6a2   : > { %2916 = vmatmul.mubr.msk.bf16.vlgmr.msra.gmra.mrb[24].mxu0 %vm1032_vm5, %v1579_v50 }
 0x6a3   : > { %2927 = vmatprep.mubr.msk.bf16.mxu0 %vm3351_vm4, %v3350_v29 }
 0x6a6   : > { %2910 = vmatmul.mubr.msk.bf16.vlgmr.msra.gmra.mrb[20].mxu1 %vm1032_vm5, %v1528_v51 }
 0x6a7   : > { %2921 = vmatprep.mubr.msk.bf16.mxu1 %vm3351_vm4, %v3350_v29 }
 0x76d   : > { %v3811_v52 = vpop.f32.mrb[20].mxu0 }
 0x76e   : > { %v2905_v53 = vpop.f32.mrb[21].mxu0 }
 0x76f   : > { %v3813_v54 = vpop.f32.mrb[22].mxu0 }
 0x770   : > { %v1515_v55 = vpack.c.bf16 %v3813_v54, %v3811_v52  ;;  %v2906_v56 = vpop.f32.mrb[23].mxu0 }
 0x771   : > { %v3817_v57 = vpop.f32.mrb[16].mxu1 }
 0x772   : > { %v2899_v58 = vpop.f32.mrb[17].mxu1 }
 0x773   : > { %v3819_v59 = vpop.f32.mrb[18].mxu1 }
 0x774   : > { %v1514_v60 = vpack.c.bf16 %v3819_v59, %v3817_v57  ;;  %v2900_v61 = vpop.f32.mrb[19].mxu1 }
 0x775   : > { %v1622_v62 = vpop.f32.mrb[24].mxu0 }
 0x776   : > { %v2917_v63 = vpop.f32.mrb[25].mxu0  ;;  %v1635_v8 = vsel %vm1127_vm6, %v1622_v62, -inf }
 0x777   : > { %v1625_v0 = vpop.f32.mrb[26].mxu0 }
 0x778   : > { %v2918_v1 = vpop.f32.mrb[27].mxu0  ;;  %v1638_v9 = vsel %vm1127_vm6, %v1625_v0, -inf }
 0x779   : > { %v1571_v2 = vpop.f32.mrb[20].mxu1 }
 0x77a   : > { %v2911_v3 = vpop.f32.mrb[21].mxu1  ;;  %v1629_v4 = vsel %vm1127_vm6, %v1571_v2, -inf }
 0x77b   : > { %1630 = vmax.xlane.f32.xlu0 %v1629_v4  ;;  %v1574_v5 = vpop.f32.mrb[22].mxu1 }
 0x77c   : > { %v2912_v6 = vpop.f32.mrb[23].mxu1  ;;  %v1632_v7 = vsel %vm1127_vm6, %v1574_v5, -inf }
 0x77d   : > { %1633 = vmax.xlane.f32.xlu1 %v1632_v7 }
 0x77f   : > { %1636 = vmax.xlane.f32.xlu0 %v1635_v8 }
 0x783   : > { %1639 = vmax.xlane.f32.xlu0 %v1638_v9 }
 0x78e   : > { %1722 = vrot.lane.b32.xlu1 %v3725_v47, %s3353_s15 }
 0x792   : > { %1784 = vrot.lane.b32.xlu1 %v3711_v37, %s3354_s17 }
 0x808   : > { %v1631_v10 = vpop.xlane.xlu0 %1630 }
 0x809   : > { %v1641_v12 = vsub.f32 %v1571_v2, %v1631_v10 }
 0x80a   : > { %v1634_v11 = vpop.xlane.xlu1 %1633 }
 0x80b   : > { %v1645_v16 = vmul.f32 1.442695, %v1641_v12  ;;  %v1642_v17 = vsub.f32 %v1574_v5, %v1634_v11 }
 0x80c   : > { %v1637_v13 = vpop.xlane.xlu0 %1636 }
 0x80d   : > { %v1643_v14 = vsub.f32 %v1622_v62, %v1637_v13  ;;  %v1647_v21 = vmul.f32 1.442695, %v1642_v17 }
 0x80e   : > { %v1723_v15 = vpop.permute.xlu1 %1722 }
 0x80f   : > { %v1649_v18 = vmul.f32 1.442695, %v1643_v14  ;;  %2926 = vmatpush3.bf16.msra.mxu0 %v1723_v15 }
 0x810   : > { %v1640_v19 = vpop.xlane.xlu0 %1639  ;;  %2937 = vmatprep.subr.bf16.mxu0 %v3350_v29 }
 0x811   : > { %3115 = vpow2.f32 %v1649_v18  ;;  %v1644_v20 = vsub.f32 %v1625_v0, %v1640_v19 }
 0x812   : > { %3117 = vpow2.f32 %v1645_v16  ;;  %v1785_v31 = vpop.permute.xlu1 %1784 }
 0x813   : > { %v1651_v22 = vmul.f32 1.442695, %v1644_v20  ;;  %v1790_v53 = vsel %vm1032_vm5, %v1785_v31, 0 }
 0x815   : > { %3119 = vpow2.f32 %v1651_v22 }
 0x816   : > { %3121 = vpow2.f32 %v1647_v21 }
 0x81b   : > { %v3116_v37 = vpop.eup %3115 }
 0x81c   : > { %v1659_v23 = vsel %vm1127_vm6, %v3116_v37, 0.0  ;;  %v3118_v24 = vpop.eup %3117 }
 0x81d   : > { %1660 = vadd.xlane.f32.xlu0 %v1659_v23  ;;  %v1653_v26 = vsel %vm1127_vm6, %v3118_v24, 0.0 }
 0x81f   : > { %v3120_v25 = vpop.eup %3119 }
 0x820   : > { %v1662_v27 = vsel %vm1127_vm6, %v3120_v25, 0.0  ;;  %v3122_v28 = vpop.eup %3121 }
 0x821   : > { %1654 = vadd.xlane.f32.xlu0 %v1653_v26  ;;  %1663 = vadd.xlane.f32.xlu1 %v1662_v27  ;;  %v1656_v30 = vsel %vm1127_vm6, %v3122_v28, 0.0 }
 0x825   : > { %1657 = vadd.xlane.f32.xlu1 %v1656_v30 }
 0x836   : > { %1835 = vrot.lane.b32.xlu1 %v3709_v34, %s3354_s17 }
 0x837   : > { %1675 = vrot.lane.b32.xlu0 %v3729_v49, %s3353_s15 }
 0x83a   : > { %1833 = vrot.lane.b32.xlu1 %v3715_v40, %s3354_s17 }
 0x83b   : > { %1782 = vrot.lane.b32.xlu0 %v3719_v43, %s3354_s17 }
 0x8aa   : > { %v1661_v32 = vpop.xlane.xlu0 %1660 }
 0x8ab   : > { %3123 = vrcp.f32 %v1661_v32 }
 0x8ae   : > { %v1655_v33 = vpop.xlane.xlu0 %1654  ;;  %v1664_v35 = vpop.xlane.xlu1 %1663 }
 0x8af   : > { %3125 = vrcp.f32 %v1664_v35 }
 0x8b0   : > { %3127 = vrcp.f32 %v1655_v33 }
 0x8b2   : > { %v1676_v36 = vpop.permute.xlu0 %1675  ;;  %v1658_v38 = vpop.xlane.xlu1 %1657 }
 0x8b3   : > { %3129 = vrcp.f32 %v1658_v38  ;;  %2920 = vmatpush3.bf16.msra.mxu1 %v1676_v36 }
 0x8b4   : > { %2931 = vmatprep.subr.bf16.mxu1 %v3350_v29 }
 0x8b5   : > { %v3124_v34 = vpop.eup %3123 }
 0x8b6   : > { %v1671_v40 = vmul.f32 %v3124_v34, %v3116_v37  ;;  %v1836_v44 = vpop.permute.xlu1 %1835  ;;  %v1783_v58 = vpop.permute.xlu0 %1782 }
 0x8b7   : > { %v1841_v50 = vsel %vm1032_vm5, %v1836_v44, 0 }
 0x8b9   : > { %v3126_v39 = vpop.eup %3125 }
 0x8ba   : > { %v3128_v41 = vpop.eup %3127  ;;  %v1672_v42 = vmul.f32 %v3126_v39, %v3120_v25  ;;  %v1834_v56 = vpop.permute.xlu1 %1833 }
 0x8bb   : > { %v1669_v46 = vmul.f32 %v3128_v41, %v3118_v24 }
 0x8bc   : > { %v1674_v45 = vpack.c.bf16 %v1672_v42, %v1671_v40 }
 0x8bd   : > { %v3130_v43 = vpop.eup %3129 }
 0x8be   : > { %v1670_v48 = vmul.f32 %v3130_v43, %v3122_v28  ;;  %2928 = vmatmul.mubr.msk.bf16.vlgmr.msra.gmra.mrb[28].mxu0 %vm1127_vm6, %v1674_v45 }
 0x8bf   : > { %2938 = vmatpush3.bf16.xpose.msra.mxu0 %v1841_v50  ;;  %2939 = vmatprep.mubr.msk.bf16.mxu0 %vm3351_vm4, %v3350_v29 }
 0x8c0   : > { %v1673_v51 = vpack.c.bf16 %v1670_v48, %v1669_v46  ;;  %2949 = vmatprep.subr.bf16.mxu0 %v3350_v29 }
 0x8c2   : > { %2922 = vmatmul.mubr.msk.bf16.vlgmr.msra.gmra.mrb[24].mxu1 %vm1127_vm6, %v1673_v51 }
 0x8c3   : > { %2932 = vmatpush3.bf16.xpose.msra.mxu1 %v1790_v53  ;;  %2933 = vmatprep.mubr.msk.bf16.mxu1 %vm3351_vm4, %v3350_v29 }
 0x8c4   : > { %2943 = vmatprep.subr.bf16.mxu1 %v3350_v29 }
 0x8c6   : > { %2940 = vmatmul.mubr.msk.bf16.vlgmr.msra.gmra.mrb[32].mxu0 %vm1032_vm5, %v1834_v56  ;;  %v3075_v56 = vld [vmem:[%s3649_s30] sm:$0xff]  }
 0x8c7   : > { %2951 = vmatprep.mubr.msk.bf16.mxu0 %vm3351_vm4, %v3350_v29 }
 0x8ca   : > { %2934 = vmatmul.mubr.msk.bf16.vlgmr.msra.gmra.mrb[28].mxu1 %vm1032_vm5, %v1783_v58  ;;  %v3076_v58 = vld [vmem:[%s3649_s30 + $0x8] sm:$0xff]   ;;  %s4085_s30 = scalar_lea.vmem [#allocation9], %s3615_s19 }
 0x8cb   : > { %2945 = vmatprep.mubr.msk.bf16.mxu1 %vm3351_vm4, %v3350_v29  ;;  %s4086_s29 = smov %s4085_s30 }
 0x991   : > { %v1762_v61 = vpop.f32.mrb[28].mxu0 }
 0x992   : > { %v2929_v62 = vpop.f32.mrb[29].mxu0 }
 0x993   : > { %v1765_v63 = vpop.f32.mrb[30].mxu0 }
 0x994   : > { %v1770_v0 = vpack.c.bf16 %v1765_v63, %v1762_v61  ;;  %v2930_v1 = vpop.f32.mrb[31].mxu0 }
 0x995   : > { %v1715_v2 = vpop.f32.mrb[24].mxu1 }
 0x996   : > { %v2923_v3 = vpop.f32.mrb[25].mxu1 }
 0x997   : > { %v1718_v4 = vpop.f32.mrb[26].mxu1 }
 0x998   : > { %v1769_v5 = vpack.c.bf16 %v1718_v4, %v1715_v2  ;;  %v2924_v6 = vpop.f32.mrb[27].mxu1 }
 0x999   : > { %v1877_v7 = vpop.f32.mrb[32].mxu0 }
 0x99a   : > { %v2941_v8 = vpop.f32.mrb[33].mxu0  ;;  %v1890_v16 = vsel %vm1127_vm6, %v1877_v7, -inf }
 0x99b   : > { %v1880_v9 = vpop.f32.mrb[34].mxu0 }
 0x99c   : > { %v2942_v10 = vpop.f32.mrb[35].mxu0  ;;  %v1893_v17 = vsel %vm1127_vm6, %v1880_v9, -inf }
 0x99d   : > { %v1826_v11 = vpop.f32.mrb[28].mxu1 }
 0x99e   : > { %v2935_v12 = vpop.f32.mrb[29].mxu1  ;;  %v1884_v13 = vsel %vm1127_vm6, %v1826_v11, -inf }
 0x99f   : > { %1885 = vmax.xlane.f32.xlu0 %v1884_v13  ;;  %v1829_v29 = vpop.f32.mrb[30].mxu1  ;;  %v3078_v12 = vld [vmem:[%s4086_s29 + $0x8] sm:$0xff]   ;;  %v3079_v13 = vld [vmem:[%s3667_s9] sm:$0xff]  }
 0x9a0   : > { %v2936_v14 = vpop.f32.mrb[31].mxu1  ;;  %v1887_v15 = vsel %vm1127_vm6, %v1829_v29, -inf }
 0x9a1   : > { %1888 = vmax.xlane.f32.xlu1 %v1887_v15 }
 0x9a3   : > { %1891 = vmax.xlane.f32.xlu0 %v1890_v16  ;;  %v3151_v16 = vld [vmem:[#allocation2] sm:$0xff] }
 0x9a7   : > { %1894 = vmax.xlane.f32.xlu0 %v1893_v17 }
 0xa2c   : > { %v1886_v18 = vpop.xlane.xlu0 %1885 }
 0xa2d   : > { %v1896_v19 = vsub.f32 %v1826_v11, %v1886_v18  ;;  %v3077_v11 = vld [vmem:[%s4085_s30] sm:$0xff]  }
 0xa2e   : > { %v1889_v20 = vpop.xlane.xlu1 %1888 }
 0xa2f   : > { %v1900_v37 = vmul.f32 1.442695, %v1896_v19  ;;  %v1897_v23 = vsub.f32 %v1829_v29, %v1889_v20  ;;  %v3080_v29 = vld [vmem:[%s3667_s9 + $0x8] sm:$0xff]   ;;  %v3152_v20 = vld [vmem:[#allocation2 + $0x10] sm:$0xff] }
 0xa30   : > { %v1892_v21 = vpop.xlane.xlu0 %1891 }
 0xa31   : > { %v1898_v22 = vsub.f32 %v1877_v7, %v1892_v21  ;;  %v1902_v27 = vmul.f32 1.442695, %v1897_v23 }
 0xa33   : > { %v1904_v24 = vmul.f32 1.442695, %v1898_v22  ;;  %v3153_v22 = vld [vmem:[#allocation2 + $0x8] sm:$0xff] }
 0xa34   : > { %v1895_v25 = vpop.xlane.xlu0 %1894 }
 0xa35   : > { %3131 = vpow2.f32 %v1904_v24  ;;  %v1899_v26 = vsub.f32 %v1880_v9, %v1895_v25  ;;  %v3154_v24 = vld [vmem:[#allocation2 + $0x18] sm:$0xff] }
 0xa36   : > { %3133 = vpow2.f32 %v1900_v37 }
 0xa37   : > { %v1906_v28 = vmul.f32 1.442695, %v1899_v26 }
 0xa39   : > { %3135 = vpow2.f32 %v1906_v28 }
 0xa3a   : > { %3137 = vpow2.f32 %v1902_v27 }
 0xa3f   : > { %v3132_v30 = vpop.eup %3131 }
 0xa40   : > { %v1914_v31 = vsel %vm1127_vm6, %v3132_v30, 0.0  ;;  %v3134_v32 = vpop.eup %3133 }
 0xa41   : > { %1915 = vadd.xlane.f32.xlu0 %v1914_v31  ;;  %v1908_v35 = vsel %vm1127_vm6, %v3134_v32, 0.0 }
 0xa43   : > { %v3136_v33 = vpop.eup %3135 }
 0xa44   : > { %v1917_v36 = vsel %vm1127_vm6, %v3136_v33, 0.0  ;;  %v3138_v38 = vpop.eup %3137 }
 0xa45   : > { %1909 = vadd.xlane.f32.xlu0 %v1908_v35  ;;  %1918 = vadd.xlane.f32.xlu1 %v1917_v36  ;;  %v1911_v34 = vsel %vm1127_vm6, %v3138_v38, 0.0 }
 0xa49   : > { %1912 = vadd.xlane.f32.xlu1 %v1911_v34 }
 0xa5a   : > { %1977 = vrot.lane.b32.xlu1 %v3725_v47, %s3354_s17 }
 0xa5b   : > { %1930 = vrot.lane.b32.xlu0 %v3729_v49, %s3354_s17 }
 0xa5e   : > { %1518 = vrot.lane.b32.xlu1 %v1514_v60, %s3355_s13 }
 0xa5f   : > { %1773 = vrot.lane.b32.xlu0 %v1769_v5, %s3356_s26 }
 0xa62   : > { %1520 = vrot.lane.b32.xlu1 %v1515_v55, %s3355_s13 }
 0xa66   : > { %1775 = vrot.lane.b32.xlu1 %v1770_v0, %s3356_s26 }
 0xace   : > { %v1916_v39 = vpop.xlane.xlu0 %1915 }
 0xacf   : > { %3139 = vrcp.f32 %v1916_v39 }
 0xad2   : > { %v1910_v47 = vpop.xlane.xlu0 %1909  ;;  %v1919_v41 = vpop.xlane.xlu1 %1918 }
 0xad3   : > { %3141 = vrcp.f32 %v1919_v41 }
 0xad4   : > { %3143 = vrcp.f32 %v1910_v47 }
 0xad6   : > { %v1931_v49 = vpop.permute.xlu0 %1930  ;;  %v1913_v40 = vpop.xlane.xlu1 %1912 }
 0xad7   : > { %3145 = vrcp.f32 %v1913_v40  ;;  %2944 = vmatpush3.bf16.msra.mxu1 %v1931_v49 }
 0xad8   : > { %2955 = vmatprep.subr.bf16.mxu1 %v3075_v56 }
 0xad9   : > { %v3140_v59 = vpop.eup %3139 }
 0xada   : > { %v1978_v57 = vpop.permute.xlu1 %1977  ;;  %v1926_v54 = vmul.f32 %v3140_v59, %v3132_v30  ;;  %v1774_v44 = vpop.permute.xlu0 %1773 }
 0xadb   : > { %2950 = vmatpush3.bf16.msra.mxu0 %v1978_v57 }
 0xadc   : > { %2963 = vmatprep.subr.bf16.mxu0 %v3077_v11 }
 0xadd   : > { %v3142_v60 = vpop.eup %3141 }
 0xade   : > { %v1519_v42 = vpop.permute.xlu1 %1518  ;;  %v3144_v52 = vpop.eup %3143  ;;  %v1927_v55 = vmul.f32 %v3142_v60, %v3136_v33 }
 0xadf   : > { %1525 = vst.msk [vmem:[#allocation3] sm:$0xff] %vm1524_vm7, %v1519_v42  ;;  %v1924_v46 = vmul.f32 %v3144_v52, %v3134_v32 }
 0xae0   : > { %1780 = vst.msk [vmem:[#allocation3] sm:$0xff] %vm1779_vm8, %v1774_v44  ;;  %v1929_v45 = vpack.c.bf16 %v1927_v55, %v1926_v54 }
 0xae1   : > { %v3146_v43 = vpop.eup %3145 }
 0xae2   : > { %v1925_v48 = vmul.f32 %v3146_v43, %v3138_v38  ;;  %v1521_v50 = vpop.permute.xlu1 %1520  ;;  %2952 = vmatmul.mubr.msk.bf16.vlgmr.msra.gmra.mrb[36].mxu0 %vm1127_vm6, %v1929_v45 }
 0xae3   : > { %1526 = vst.msk [vmem:[#allocation3 + $0x8] sm:$0xff] %vm1524_vm7, %v1521_v50  ;;  %2964 = vmatpush3.bf16.msra.mxu0 %v3077_v11 }
 0xae4   : > { %v1928_v51 = vpack.c.bf16 %v1925_v48, %v1924_v46  ;;  %2965 = vmatprep.subr.bf16.mxu0 %v3078_v12 }
 0xae6   : > { %2946 = vmatmul.mubr.msk.bf16.vlgmr.msra.gmra.mrb[32].mxu1 %vm1127_vm6, %v1928_v51  ;;  %v1776_v53 = vpop.permute.xlu1 %1775 }
 0xae7   : > { %1781 = vst.msk [vmem:[#allocation3 + $0x8] sm:$0xff] %vm1779_vm8, %v1776_v53  ;;  %2956 = vmatpush3.bf16.msra.mxu1 %v3075_v56  ;;  %2966 = vmatpush3.bf16.msra.mxu0 %v3078_v12 }
 0xae8   : > { %2957 = vmatprep.subr.bf16.mxu1 %v3076_v58 }
 0xaeb   : > { %2958 = vmatpush3.bf16.msra.mxu1 %v3076_v58 }
 0xaec   : > { %2971 = vmatprep.subr.bf16.mxu1 %v3079_v13 }
 0xbb5   : > { %v2017_v61 = vpop.f32.mrb[36].mxu0 }
 0xbb6   : > { %v2953_v62 = vpop.f32.mrb[37].mxu0 }
 0xbb7   : > { %v2020_v63 = vpop.f32.mrb[38].mxu0 }
 0xbb8   : > { %v2025_v0 = vpack.c.bf16 %v2020_v63, %v2017_v61  ;;  %v2954_v1 = vpop.f32.mrb[39].mxu0 }
 0xbb9   : > { %v1970_v2 = vpop.f32.mrb[32].mxu1  ;;  %v2739_v1 = vld [vmem:[%s4087_s3] ss:$0 sm:$0xff] }
 0xbba   : > { %v2947_v3 = vpop.f32.mrb[33].mxu1  ;;  %2030 = vrot.lane.b32.xlu1 %v2025_v0, %s3357_s24 }
 0xbbb   : > { %v1973_v4 = vpop.f32.mrb[34].mxu1 }
 0xbbc   : > { %v2024_v5 = vpack.c.bf16 %v1973_v4, %v1970_v2  ;;  %v2948_v6 = vpop.f32.mrb[35].mxu1 }
 0xbbd   : > { %v2740_v6 = vld [vmem:[%s4088_s27] ss:$0 sm:$0xff] }
 0xbbe   : > { %2028 = vrot.lane.b32.xlu0 %v2024_v5, %s3357_s24 }
 0xc2c   : > { %v2031_v7 = vpop.permute.xlu1 %2030 }
 0xc2d   : > { %2036 = vst.msk [vmem:[#allocation3 + $0x8] sm:$0xff] %vm2034_vm9, %v2031_v7 }
 0xc30   : > { %v2029_v8 = vpop.permute.xlu0 %2028 }
 0xc31   : > { %2035 = vst.msk [vmem:[#allocation3] sm:$0xff] %vm2034_vm9, %v2029_v8 }
 0xc34   : > { %v2038_v10 = vld [vmem:[#allocation3 + $0x8] sm:$0xff] }
 0xc38   : > { %v2037_v9 = vld [vmem:[#allocation3] sm:$0xff] }
 0xc39   : > { %2959 = vmatprep.mubr.msk.bf16.mxu1 %vm840_vm3, %v2037_v9 }
 0xc3a   : > { %2960 = vmatmul.mubr.msk.bf16.vlgmr.msra.gmra.mrb[36].mxu1 %vm840_vm3, %v2038_v10 }
 0xc3b   : > { %2972 = vmatpush3.bf16.msra.mxu1 %v3079_v13 }
 0xc3c   : > { %2973 = vmatprep.subr.bf16.mxu1 %v3080_v29 }
 0xc3f   : > { %2974 = vmatpush3.bf16.msra.mxu1 %v3080_v29 }
 0xd0d   : > { %v2961_v14 = vpop.f32.mrb[36].mxu1 }
 0xd0e   : > { %v2095_v15 = vpop.f32.mrb[37].mxu1  ;;  %v2112_v21 = vadd.f32 %v3152_v20, %v2961_v14 }
 0xd0f   : > { %v2110_v17 = vadd.f32 %v3151_v16, %v2095_v15  ;;  %v2962_v18 = vpop.f32.mrb[38].mxu1  ;;  %v3081_v16 = vld [vmem:[%s3667_s9 + $0x10] sm:$0xff]  }
 0xd10   : > { %v2098_v19 = vpop.f32.mrb[39].mxu1  ;;  %v2113_v25 = vadd.f32 %v3154_v24, %v2962_v18  ;;  %v2119_v28 = vsel %vm840_vm3, %v2112_v21, 0.0  ;;  %2975 = vmatprep.subr.bf16.mxu1 %v3081_v16  ;;  %v2741_v18 = vld [vmem:[%s719_s14] ss:$0 sm:$0xff] }
 0xd11   : > { %v2111_v37 = vadd.f32 %v3153_v22, %v2098_v19  ;;  %v2116_v23 = vsel %vm840_vm3, %v2110_v17, 0.0  ;;  %2976 = vmatpush3.bf16.msra.mxu1 %v3081_v16 }
 0xd12   : > { %v2121_v31 = vsel %vm840_vm3, %v2113_v25, 0.0 }
 0xd13   : > { %v2117_v26 = vsel %vm840_vm3, %v2111_v37, 0.0 }
 0xd14   : > { %v2118_v27 = vadd.f32 %v2117_v26, %v2116_v23 }
 0xd16   : > { %v2120_v30 = vadd.f32 %v2119_v28, %v2118_v27 }
 0xd18   : > { %v2122_v32 = vadd.f32 %v2121_v31, %v2120_v30 }
 0xd1a   : > { %v2123_v33 = vrot.slane %v2122_v32, 4 }
 0xd1c   : > { %v2124_v35 = vadd.f32 %v2123_v33, %v2122_v32  ;;  %v2746_v33 = vld [vmem:[%s727_s28] ss:$0 sm:$0xff] }
 0xd1e   : > { %v2125_v36 = vrot.slane %v2124_v35, 2 }
 0xd20   : > { %v2126_v38 = vadd.f32 %v2125_v36, %v2124_v35 }
 0xd22   : > { %v2127_v34 = vrot.slane %v2126_v38, 1 }
 0xd24   : > { %v2128_v39 = vadd.f32 %v2127_v34, %v2126_v38 }
 0xd26   : > { %v2129_v47 = vmul.f32 0.03125, %v2128_v39 }
 0xd28   : > { %v2130_v41 = vsub.f32 %v2110_v17, %v2129_v47  ;;  %v2131_v49 = vsub.f32 %v2111_v37, %v2129_v47  ;;  %v2132_v40 = vsub.f32 %v2112_v21, %v2129_v47  ;;  %v2133_v57 = vsub.f32 %v2113_v25, %v2129_v47  ;;  %v3082_v17 = vld [vmem:[%s3667_s9 + $0x18] sm:$0xff]  }
 0xd29   : > { %2977 = vmatprep.subr.bf16.mxu1 %v3082_v17 }
 0xd2a   : > { %v2134_v59 = vmul.f32 %v2130_v41, %v2130_v41  ;;  %v2135_v60 = vmul.f32 %v2131_v49, %v2131_v49  ;;  %v2136_v42 = vmul.f32 %v2132_v40, %v2132_v40  ;;  %v2137_v52 = vmul.f32 %v2133_v57, %v2133_v57  ;;  %2978 = vmatpush3.bf16.msra.mxu1 %v3082_v17 }
 0xd2c   : > { %v2138_v54 = vsel %vm840_vm3, %v2134_v59, 0.0  ;;  %v2139_v55 = vsel %vm840_vm3, %v2135_v60, 0.0  ;;  %v2141_v43 = vsel %vm840_vm3, %v2136_v42, 0.0  ;;  %v2143_v46 = vsel %vm840_vm3, %v2137_v52, 0.0 }
 0xd2d   : > { %v2140_v44 = vadd.f32 %v2139_v55, %v2138_v54 }
 0xd2f   : > { %v2142_v45 = vadd.f32 %v2141_v43, %v2140_v44 }
 0xd31   : > { %v2144_v48 = vadd.f32 %v2143_v46, %v2142_v45 }
 0xd33   : > { %v2145_v50 = vrot.slane %v2144_v48, 4 }
 0xd35   : > { %v2146_v51 = vadd.f32 %v2145_v50, %v2144_v48 }
 0xd37   : > { %v2147_v53 = vrot.slane %v2146_v51, 2 }
 0xd39   : > { %v2148_v56 = vadd.f32 %v2147_v53, %v2146_v51 }
 0xd3b   : > { %v2149_v58 = vrot.slane %v2148_v56, 1 }
 0xd3d   : > { %v2150_v61 = vadd.f32 %v2149_v58, %v2148_v56 }
 0xd3f   : > { %v2151_v62 = vmul.f32 0.03125, %v2150_v61 }
 0xd41   : > { %v2152_v63 = vadd.f32 1e-05, %v2151_v62 }
 0xd43   : > { %3147 = vrsqrt.f32 %v2152_v63 }
 0xd4d   : > { %v3148_v0 = vpop.eup %3147 }
 0xd4e   : > { %v2155_v2 = vmul.f32 %v3148_v0, %v2131_v49  ;;  %v2156_v3 = vmul.f32 %v3148_v0, %v2132_v40  ;;  %v2157_v4 = vmul.f32 %v3148_v0, %v2133_v57  ;;  %v2154_v5 = vmul.f32 %v3148_v0, %v2130_v41 }
 0xd50   : > { %v2165_v7 = vmul.f32 %v2739_v1, %v2155_v2  ;;  %v2166_v8 = vmul.f32 %v2739_v1, %v2156_v3  ;;  %v2167_v9 = vmul.f32 %v2739_v1, %v2157_v4  ;;  %v2164_v10 = vmul.f32 %v2739_v1, %v2154_v5 }
 0xd52   : > { %v2175_v11 = vadd.f32 %v2740_v6, %v2165_v7  ;;  %v2174_v12 = vadd.f32 %v2740_v6, %v2164_v10  ;;  %v2176_v13 = vadd.f32 %v2740_v6, %v2166_v8  ;;  %v2177_v29 = vadd.f32 %v2740_v6, %v2167_v9 }
 0xd54   : > { %v2178_v14 = vpack.c.bf16 %v2175_v11, %v2174_v12  ;;  %v2179_v15 = vpack.c.bf16 %v2177_v29, %v2176_v13 }
 0xd56   : > { %2967 = vmatprep.mubr.msk.bf16.mxu0 %vm840_vm3, %v2178_v14 }
 0xd57   : > { %2968 = vmatmul.mubr.msk.bf16.vlgmr.msra.gmra.mrb[40].mxu0 %vm840_vm3, %v2179_v15 }
 0xe2a   : > { %v2969_v19 = vpop.f32.mrb[40].mxu0 }
 0xe2b   : > { %v2252_v20 = vadd.f32 %v2969_v19, %v2741_v18  ;;  %v2243_v21 = vpop.f32.mrb[41].mxu0 }
 0xe2c   : > { %v2244_v22 = vadd.f32 %v2741_v18, %v2243_v21  ;;  %v2970_v37 = vpop.f32.mrb[42].mxu0 }
 0xe2d   : > { %v2255_v23 = vadd.f32 %v2970_v37, %v2741_v18  ;;  %v2246_v24 = vpop.f32.mrb[43].mxu0  ;;  %v2260_v26 = vmax.f32 %v2252_v20, 0.0  ;;  %v2753_v20 = vld [vmem:[%s730_s6] ss:$0 sm:$0xff] }
 0xe2e   : > { %v2247_v25 = vadd.f32 %v2741_v18, %v2246_v24  ;;  %v2258_v28 = vmax.f32 %v2244_v22, 0.0  ;;  %v2754_v24 = vld [vmem:[%s733_s23] ss:$0 sm:$0xff] }
 0xe2f   : > { %v2261_v27 = vmax.f32 %v2255_v23, 0.0 }
 0xe30   : > { %v2259_v30 = vmax.f32 %v2247_v25, 0.0 }
 0xe31   : > { %v2263_v31 = vpack.c.bf16 %v2261_v27, %v2260_v26 }
 0xe32   : > { %v2262_v32 = vpack.c.bf16 %v2259_v30, %v2258_v28 }
 0xe34   : > { %2979 = vmatprep.mubr.msk.bf16.mxu1 %vm2303_vm10, %v2262_v32 }
 0xe35   : > { %2980 = vmatmul.mubr.msk.bf16.vlgmr.msra.gmra.mrb[40].mxu1 %vm2303_vm10, %v2263_v31 }
 0xf08   : > { %v2981_v35 = vpop.f32.mrb[40].mxu1 }
 0xf09   : > { %v2344_v36 = vpop.f32.mrb[41].mxu1  ;;  %v2353_v38 = vadd.f32 %v2981_v35, %v2746_v33 }
 0xf0a   : > { %v2345_v34 = vadd.f32 %v2746_v33, %v2344_v36  ;;  %v2982_v39 = vpop.f32.mrb[42].mxu1 }
 0xf0b   : > { %v2347_v47 = vpop.f32.mrb[43].mxu1  ;;  %v2356_v49 = vadd.f32 %v2982_v39, %v2746_v33  ;;  %v2361_v57 = vadd.f32 %v2353_v38, %v2176_v13 }
 0xf0c   : > { %v2359_v41 = vadd.f32 %v2345_v34, %v2174_v12  ;;  %v2348_v40 = vadd.f32 %v2746_v33, %v2347_v47 }
 0xf0d   : > { %v2362_v42 = vadd.f32 %v2356_v49, %v2177_v29  ;;  %v2368_v55 = vsel %vm840_vm3, %v2361_v57, 0.0 }
 0xf0e   : > { %v2360_v59 = vadd.f32 %v2348_v40, %v2175_v11  ;;  %v2365_v60 = vsel %vm840_vm3, %v2359_v41, 0.0 }
 0xf0f   : > { %v2370_v43 = vsel %vm840_vm3, %v2362_v42, 0.0 }
 0xf10   : > { %v2366_v52 = vsel %vm840_vm3, %v2360_v59, 0.0 }
 0xf11   : > { %v2367_v54 = vadd.f32 %v2366_v52, %v2365_v60 }
 0xf13   : > { %v2369_v44 = vadd.f32 %v2368_v55, %v2367_v54 }
 0xf15   : > { %v2371_v45 = vadd.f32 %v2370_v43, %v2369_v44 }
 0xf17   : > { %v2372_v46 = vrot.slane %v2371_v45, 4 }
 0xf19   : > { %v2373_v48 = vadd.f32 %v2372_v46, %v2371_v45 }
 0xf1b   : > { %v2374_v50 = vrot.slane %v2373_v48, 2 }
 0xf1d   : > { %v2375_v51 = vadd.f32 %v2374_v50, %v2373_v48 }
 0xf1f   : > { %v2376_v53 = vrot.slane %v2375_v51, 1 }
 0xf21   : > { %v2377_v56 = vadd.f32 %v2376_v53, %v2375_v51 }
 0xf23   : > { %v2378_v58 = vmul.f32 0.03125, %v2377_v56 }
 0xf25   : > { %v2379_v61 = vsub.f32 %v2359_v41, %v2378_v58  ;;  %v2380_v62 = vsub.f32 %v2360_v59, %v2378_v58  ;;  %v2381_v63 = vsub.f32 %v2361_v57, %v2378_v58  ;;  %v2382_v0 = vsub.f32 %v2362_v42, %v2378_v58 }
 0xf27   : > { %v2383_v1 = vmul.f32 %v2379_v61, %v2379_v61  ;;  %v2384_v2 = vmul.f32 %v2380_v62, %v2380_v62  ;;  %v2385_v3 = vmul.f32 %v2381_v63, %v2381_v63  ;;  %v2386_v4 = vmul.f32 %v2382_v0, %v2382_v0 }
 0xf29   : > { %v2387_v5 = vsel %vm840_vm3, %v2383_v1, 0.0  ;;  %v2388_v6 = vsel %vm840_vm3, %v2384_v2, 0.0  ;;  %v2390_v8 = vsel %vm840_vm3, %v2385_v3, 0.0  ;;  %v2392_v10 = vsel %vm840_vm3, %v2386_v4, 0.0 }
 0xf2a   : > { %v2389_v7 = vadd.f32 %v2388_v6, %v2387_v5 }
 0xf2c   : > { %v2391_v9 = vadd.f32 %v2390_v8, %v2389_v7 }
 0xf2e   : > { %v2393_v11 = vadd.f32 %v2392_v10, %v2391_v9 }
 0xf30   : > { %v2394_v12 = vrot.slane %v2393_v11, 4 }
 0xf32   : > { %v2395_v13 = vadd.f32 %v2394_v12, %v2393_v11 }
 0xf34   : > { %v2396_v29 = vrot.slane %v2395_v13, 2 }
 0xf36   : > { %v2397_v14 = vadd.f32 %v2396_v29, %v2395_v13 }
 0xf38   : > { %v2398_v15 = vrot.slane %v2397_v14, 1 }
 0xf3a   : > { %v2399_v16 = vadd.f32 %v2398_v15, %v2397_v14 }
 0xf3c   : > { %v2400_v17 = vmul.f32 0.03125, %v2399_v16 }
 0xf3e   : > { %v2401_v18 = vadd.f32 1e-05, %v2400_v17 }
 0xf40   : > { %3149 = vrsqrt.f32 %v2401_v18 }
 0xf4a   : > { %v3150_v19 = vpop.eup %3149 }
 0xf4b   : > { %v2403_v21 = vmul.f32 %v3150_v19, %v2379_v61  ;;  %v2404_v22 = vmul.f32 %v3150_v19, %v2380_v62  ;;  %v2405_v37 = vmul.f32 %v3150_v19, %v2381_v63  ;;  %v2406_v23 = vmul.f32 %v3150_v19, %v2382_v0 }
 0xf4c   : > { %2434 = sbr.rel (%p2755_p11) target bundleno = 3940 (0xf64), region = 100 }
 0xf4d   : > { %v2413_v25 = vmul.f32 %v2753_v20, %v2403_v21  ;;  %v2414_v26 = vmul.f32 %v2753_v20, %v2404_v22  ;;  %v2415_v27 = vmul.f32 %v2753_v20, %v2405_v37  ;;  %v2416_v28 = vmul.f32 %v2753_v20, %v2406_v23 }
 0xf4f   : > { %v2423_v30 = vadd.f32 %v2754_v24, %v2413_v25  ;;  %v2424_v31 = vadd.f32 %v2754_v24, %v2414_v26  ;;  %v2425_v32 = vadd.f32 %v2754_v24, %v2415_v27  ;;  %v2426_v33 = vadd.f32 %v2754_v24, %v2416_v28 }
 0xf51   : > { %2427 = vst.msk [vmem:[#allocation2] sm:$0xff] %vm840_vm3, %v2423_v30  ;;  %2428 = vst.msk [vmem:[#allocation2 + $0x8] sm:$0xff] %vm840_vm3, %v2424_v31  ;;  %v2439_v35 = vsel (!%p2755_p11), %vm840_vm3, %v2423_v30, 0.0  ;;  %v2440_v36 = vsel (!%p2755_p11), %vm840_vm3, %v2424_v31, 0.0  ;;  %v2448_v38 = vsel (!%p2755_p11), %vm840_vm3, %v2425_v32, 0.0  ;;  %v2449_v34 = vsel (!%p2755_p11), %vm840_vm3, %v2426_v33, 0.0 }
 0xf52   : > { %2429 = vst.msk [vmem:[#allocation2 + $0x10] sm:$0xff] %vm840_vm3, %v2425_v32  ;;  %2430 = vst.msk [vmem:[#allocation2 + $0x18] sm:$0xff] %vm840_vm3, %v2426_v33  ;;  %v2441_v39 = vadd.f32 (!%p2755_p11), %v2440_v36, %v2439_v35  ;;  %v2450_v47 = vadd.f32 (!%p2755_p11), %v2449_v34, %v2448_v38 }
 0xf53   : > { %2435 = vst.msk [vmem:[#allocation10] sm:$0xff] %vm840_vm3, %v2423_v30  ;;  %2436 = vst.msk [vmem:[#allocation10 + $0x8] sm:$0xff] %vm840_vm3, %v2424_v31 }
 0xf54   : > { %2437 = vst.msk [vmem:[#allocation10 + $0x10] sm:$0xff] %vm840_vm3, %v2425_v32  ;;  %2438 = vst.msk [vmem:[#allocation10 + $0x18] sm:$0xff] %vm840_vm3, %v2426_v33  ;;  %v2442_v41 = vrot.slane %v2441_v39, 4  ;;  %v2451_v49 = vrot.slane %v2450_v47, 4 }
 0xf56   : > { %v2443_v40 = vadd.f32 %v2442_v41, %v2441_v39  ;;  %v2452_v57 = vadd.f32 %v2451_v49, %v2450_v47 }
 0xf58   : > { %v2444_v59 = vrot.slane %v2443_v40, 2  ;;  %v2453_v60 = vrot.slane %v2452_v57, 2 }
 0xf5a   : > { %v2445_v42 = vadd.f32 %v2444_v59, %v2443_v40  ;;  %v2454_v52 = vadd.f32 %v2453_v60, %v2452_v57 }
 0xf5c   : > { %v2446_v54 = vrot.slane %v2445_v42, 1  ;;  %v2455_v55 = vrot.slane %v2454_v52, 1 }
 0xf5e   : > { %v2447_v44 = vadd.f32 %v2446_v54, %v2445_v42  ;;  %v2456_v43 = vadd.f32 %v2455_v55, %v2454_v52 }
 0xf60   : > { %v2458_v45 = vmul.f32 0.0625, %v2447_v44  ;;  %v2459_v46 = vmul.f32 0.0625, %v2456_v43 }
 0xf62   : > { %v2463_v48 = vsel %vm2462_vm11, %v2459_v46, %v2458_v45 }
 0xf63   : > { %2466 = vst.msk [vmem:[#allocation11] sm:$0x3] %vm2465_vm12, %v2463_v48 }
 0xf64 PF: > { %p3018_p12 = scmp.eq.s32.totalorder %s3465_s25, 1  ;;  %s3358_s6 = smov [#allocation10]  }
 0xf65   : > { %s2473_s23 = sshll.u32 %s3358_s6, 4  ;;  %s2474_s23 = int_to_ptr.vmem [resolvable:$true] %s2473_s23 }
 0xf66   : > { %s3241_s16 = scalar_lea.vmem %s2474_s23, 512  ;;  %p3248_p10 = scmp.lt.s32.totalorder %s2474_s23, %s2474_s23 }
 0xf67   : > { %p3242_p13 = scmp.ne.s32.totalorder %s2474_s23, %s3241_s16  ;;  %p3249_p1 = scmp.lt.s32.totalorder %s3241_s16, %s3241_s16 }
 0xf69   : > { %p3243_p5 = pnand %p3242_p13, %p3018_p12  ;;  %p3250_p8 = por %p3249_p1, %p3248_p10 }
 0xf6b   : > { %p3244_p9 = pneg %p3243_p5 }
 0xf6d   : > { %p3251_p0 = pnand %p3250_p8, %p3244_p9 }
 0xf6f   : > { %3254 = shalt.err (!%p3251_p0)
}
 0xf70   : > { %s4091_s29 = sld [smem:[#allocation31_spill]] }
 0xf76   : > { %s3255_s19 = scalar_lea.hbm %s4091_s29, 512 }
 0xf77   : > { %p3256_p3 = scmp.ne.s32.totalorder %s4091_s29, %s3255_s19  ;;  %p3261_p6 = scmp.lt.u32.totalorder %s3255_s19, %s4091_s29 }
 0xf79   : > { %p3257_p4 = pnand %p3256_p3, %p3018_p12 }
 0xf7b   : > { %p3258_p2 = pneg %p3257_p4 }
 0xf7d   : > { %p3263_p7 = pnand %p3261_p6, %p3258_p2 }
 0xf7f   : > { %3266 = shalt.err (!%p3263_p7)
}
 0xf80   : > { %s3359_s27 = smov 128   ;;  %s3360_s9 = smov [#allocation11]  }
 0xf81   : > { %2995 = dma.vmem_to_hbm [thread:$0]  (%p3018_p12), %s2474_s23, 512, %s4091_s29, [#allocation6], %s3359_s27, %s3359_s27, %s3355_s13  }
 0xf82   : > { %s2487_s14 = sshll.u32 %s3360_s9, 4  ;;  %s2488_s14 = int_to_ptr.vmem [resolvable:$true] %s2487_s14 }
 0xf83   : > { %s3267_s28 = scalar_lea.vmem %s2488_s14, 32  ;;  %p3274_p9 = scmp.lt.s32.totalorder %s2488_s14, %s2488_s14 }
 0xf84   : > { %p3268_p11 = scmp.ne.s32.totalorder %s2488_s14, %s3267_s28  ;;  %p3275_p10 = scmp.lt.s32.totalorder %s3267_s28, %s3267_s28 }
 0xf86   : > { %p3269_p13 = pnand %p3268_p11, %p3018_p12  ;;  %p3276_p1 = por %p3275_p10, %p3274_p9 }
 0xf88   : > { %p3270_p5 = pneg %p3269_p13 }
 0xf8a   : > { %p3277_p8 = pnand %p3276_p1, %p3270_p5 }
 0xf8c   : > { %3280 = shalt.err (!%p3277_p8)
}
 0xf8d   : > { %s4092_s15 = sld [smem:[#allocation32_spill]] }
 0xf93   : > { %s3281_s17 = scalar_lea.hbm %s4092_s15, 32 }
 0xf94   : > { %p3282_p0 = scmp.ne.s32.totalorder %s4092_s15, %s3281_s17  ;;  %p3287_p2 = scmp.lt.u32.totalorder %s3281_s17, %s4092_s15 }
 0xf96   : > { %p3283_p3 = pnand %p3282_p0, %p3018_p12 }
 0xf98   : > { %p3284_p4 = pneg %p3283_p3 }
 0xf9a   : > { %p3289_p6 = pnand %p3287_p2, %p3284_p4 }
 0xf9c   : > { %3292 = shalt.err (!%p3289_p6)
}
 0xf9d   : > { %2997 = dma.vmem_to_hbm [thread:$0]  (%p3018_p12), %s2488_s14, 32, %s4092_s15, [#allocation12]  }
 0xf9e   : > { %3322 = dma.done.wait (%p3018_p12), [#allocation6], 512  }
 0xf9f   : > { %3324 = vsyncadd (%p3018_p12), [#allocation6], 4294966784 }
 0xfa0   : > { %3326 = dma.done.wait (%p3018_p12), [#allocation12], 32  }
 0xfa1   : > { %3328 = vsyncadd (%p3018_p12), [#allocation12], 4294967264 }
 0xfa2 PF: > { %s4093_s24 = sld [smem:[#allocation19_spill]]  ;;  %s4094_s30 = sld [smem:[#allocation18_spill]] }
 0xfa3   : > { %s4095_s23 = sld [smem:[#allocation20_spill]]  ;;  %s4096_s21 = smov %s3335_s22 }
 0xfa8   : > { %p28_p7 = scmp.ge.s32.totalorder %s4093_s24, 4   ;;  %s4097_s22 = smov %s4094_s30 }
 0xfaa   :  { %30 = sbr.rel (!%p28_p7) target bundleno = 18 (0x12), region = 173 }
 0xfb1   :  { %2504 = vsyncpa [#allocation5], 1 }
 0xfb2   :  { %2506 = vsyncpa [#allocation5 + $0x1], 1 }
 0xfb3   :  { %2507 = vsyncpa [#allocation8], 1 }
 0xfb4   :  { %2508 = vsyncpa [#allocation6], 1 }
 0xfb5   :  { %2510 = vsyncpa [#allocation6 + $0x1], 1 }
 0xfb6   :  { %2511 = vsyncpa [#allocation12], 1 }

</bundles_post_ra>
